<compile_context>
chip_gen: v7x
topology: tpu7x:2x2x1
jax: 0.10.0
libtpu: 0.0.40
codegen_flags: <defaults>
</compile_context>

<pallas_src>
import numpy as np
import jax
import jax.numpy as jnp
from jax import lax
from jax.experimental import pallas as pl
from jax.experimental.pallas import tpu as pltpu

# ---- shapes consistent with the module (m=16, L=64, d_model=256; batch kept small) ----
B = 2            # batch
L = 64           # sequence length
D = 256          # d_model
M = 16           # FEB_f "m" (FFT length); Kernel_Layer has 2*M per-row weight matrices
HALF = D // 2    # 128
GK = 8           # weight rows per grid step (per output half)
KC = M // GK     # weight-row chunks per half


def _row_perm():
    # Even original y-rows first (they produce output columns [0, HALF)),
    # odd y-rows second (columns [HALF, D)) -- the reshape/view_as_complex row interleave.
    return np.concatenate([np.arange(0, 2 * M, 2), np.arange(1, 2 * M, 2)])


# --------------------------------- kernel ---------------------------------
def _feb_f_kernel(x_ref, f_ref, w_ref, g_ref, o_ref):
    # x_ref: (B, M, D)    f32   first M rows of every batch (fft(n=M) truncates the seq)
    # f_ref: (GK, M)      f32   row-chunk of the reordered stacked forward-DFT matrix
    # w_ref: (GK, D, D)   bf16  row-chunk of the reordered / column-permuted Kernel_Layer W
    # g_ref: (L, 2*GK)    f32   [C_chunk | -S_chunk] iDFT block (1/L folded in)
    # o_ref: (B, L, HALF) f32   output columns of this half, accumulated over k chunks
    k = pl.program_id(1)

    @pl.when(k == 0)
    def _():
        o_ref[...] = jnp.zeros_like(o_ref)

    # Chunk of xc = cat(Re fft, Im fft) rows (already row-reordered): (GK, B, D).
    f_blk = f_ref[...]
    xc = jnp.stack(
        [jnp.dot(f_blk, x_ref[b], preferred_element_type=jnp.float32) for b in range(B)],
        axis=1)                                                   # (GK, B, D) f32

    # Kernel_Layer: y[i, b, :] = xc[i, b, :] @ W[i]; one batched contraction, both batches
    # share every 256x256 weight push. bf16 x bf16 -> f32 accumulate (native MXU path).
    y = lax.dot_general(
        xc.astype(jnp.bfloat16), w_ref[...],
        dimension_numbers=(((2,), (1,)), ((0,), (0,))),
        preferred_element_type=jnp.float32)                       # (GK, B, D) f32
    # columns [:HALF] = Re(z) contributions, [HALF:] = Im(z) (folded into W host-side)

    # real(ifft(z, n=L)) contribution of this chunk: one fused dot per batch.
    g_blk = g_ref[...]                                            # (L, 2*GK)
    for b in range(B):                                            # B is tiny & static
        y_b = y[:, b, :]                                          # (GK, D)
        ys_b = jnp.concatenate([y_b[:, :HALF], y_b[:, HALF:]], axis=0)   # (2*GK, HALF)
        o_ref[b, :, :] += jnp.dot(g_blk, ys_b, preferred_element_type=jnp.float32)


# ----------------------------- host-side constants -----------------------------
def _dft_constants():
    perm = _row_perm()

    # Forward DFT (n=M): rows 0..M-1 -> Re, rows M..2M-1 -> Im of torch.fft.fft(x, n=M, dim=-2),
    # then reordered so even y-rows (output half 0) come first, odd rows (half 1) second.
    kk = np.arange(M).reshape(M, 1)
    jj = np.arange(M).reshape(1, M)
    ang_f = 2.0 * np.pi * kk * jj / M
    f_stack = np.concatenate([np.cos(ang_f), -np.sin(ang_f)], axis=0)[perm]      # (2M, M)

    # Inverse DFT (n=L, zero-padded) with 1/L folded in, packed per k-chunk as [C | -S].
    jl = np.arange(L).reshape(L, 1)
    pp = np.arange(M).reshape(1, M)
    ang_g = 2.0 * np.pi * jl * pp / L
    c = np.cos(ang_g) / L                                                        # (L, M)
    s = np.sin(ang_g) / L
    g_blocks = np.stack(
        [np.concatenate([c[:, k0:k0 + GK], -s[:, k0:k0 + GK]], axis=1)
         for k0 in range(0, M, GK)], axis=0)                                     # (KC, L, 2*GK)

    return jnp.asarray(f_stack, jnp.float32), jnp.asarray(g_blocks, jnp.float32)


def prepare_feb_f_params(w_kernel_layer):
    """One-time (module-init) preprocessing of the Kernel_Layer weight + DFT constants.

    Must be called ONCE and cached -- NOT per forward call (perf feedback: avoids an extra
    ~16 MiB HBM pass over the weight on every invocation).
    """
    perm = _row_perm()
    # Column permutation: [even cols | odd cols] so the kernel directly produces (Re(z)|Im(z)).
    w_cp = jnp.concatenate([w_kernel_layer[:, :, 0::2], w_kernel_layer[:, :, 1::2]], axis=-1)
    # Row reorder: even y-rows first (-> output left half), odd rows second (-> right half).
    w_prepped = jnp.take(w_cp, jnp.asarray(perm), axis=0).astype(jnp.bfloat16)   # (2M, D, D)
    f_mat, g_blocks = _dft_constants()
    return w_prepped, f_mat, g_blocks


# --------------------------------- wrapper ---------------------------------
def feb_f(x, params):
    """x: (B, L, D) float32; params: output of prepare_feb_f_params (cached at init)."""
    w_prepped, f_mat, g_blocks = params

    flops = B * (2 * (2 * M) * M * D       # forward DFT
                 + 2 * (2 * M) * D * D     # Kernel_Layer
                 + 2 * L * (2 * M) * D)    # inverse DFT
    bytes_accessed = ((2 * M) * D * D * 2      # bf16 weight (read once)
                      + B * M * D * 4          # x block
                      + B * L * D * 4          # output
                      + (2 * M) * M * 4 + KC * L * 2 * GK * 4)

    return pl.pallas_call(
        _feb_f_kernel,
        out_shape=jax.ShapeDtypeStruct((B, L, D), jnp.float32),
        grid_spec=pltpu.PrefetchScalarGridSpec(
            num_scalar_prefetch=0,
            grid=(2, KC),                                     # (output half h, weight chunk k)
            in_specs=[
                pl.BlockSpec((B, M, D), lambda h, k: (0, 0, 0)),            # x (first M rows)
                pl.BlockSpec((GK, M), lambda h, k: (h * KC + k, 0)),        # fwd-DFT rows
                pl.BlockSpec((GK, D, D), lambda h, k: (h * KC + k, 0, 0)),  # bf16 weight chunk
                pl.BlockSpec((None, L, 2 * GK), lambda h, k: (k, 0, 0)),    # iDFT chunk
            ],
            out_specs=pl.BlockSpec((B, L, HALF), lambda h, k: (0, 0, h)),
        ),
        compiler_params=pltpu.CompilerParams(
            # h is parallel (v7x megacore: each core streams only its half of the weight),
            # k is the weight-streaming / accumulation axis.
            dimension_semantics=("parallel", "arbitrary"),
        ),
        cost_estimate=pl.CostEstimate(
            flops=flops, transcendentals=0, bytes_accessed=bytes_accessed),
    )(x, f_mat, w_prepped, g_blocks)


# ------------------------- pure-JAX reference (PyTorch forward) -------------------------
def feb_f_reference(x, w):
    hp = lax.Precision.HIGHEST
    xf = jnp.fft.fft(x[:, :M, :], axis=-2)                                   # fft(n=M) truncates
    xc = jnp.concatenate([jnp.real(xf), jnp.imag(xf)], axis=-2)              # (B, 2M, D)
    y = jnp.einsum('bid,ido->bio', xc, w, precision=hp)                      # Kernel_Layer
    y = y.reshape(B, M, D, 2)
    z = y[..., 0] + 1j * y[..., 1]                                           # view_as_complex
    out = jnp.real(jnp.fft.ifft(z, n=L, axis=-2))                            # (B, L, D)
    return out.astype(jnp.float32)


if __name__ == "__main__":
    key = jax.random.PRNGKey(0)
    kx, kw = jax.random.split(key)
    x = jax.random.normal(kx, (B, L, D), jnp.float32)                # (batch, seq, d_model)
    w = jax.random.normal(kw, (2 * M, D, D), jnp.float32)            # Kernel_Layer nn.init.normal_

    # One-time weight/constant preprocessing (lives at module init in a real model).
    params = prepare_feb_f_params(w)
    params = jax.block_until_ready(params)

    out = feb_f(x, params)
    out = jax.block_until_ready(out)
    assert out.shape == (B, L, D) and out.dtype == jnp.float32

    # Validate the folded-permutation / bf16-weight formulation against the FFT reference.
    ref = feb_f_reference(x, w)
    err = float(jnp.max(jnp.abs(out - ref)))
    tol = 2e-2 * max(1.0, float(jnp.max(jnp.abs(ref))))
    assert err < tol, f"max abs error {err} (tol {tol})"

    print("KERNEL_OK")
</pallas_src>

<mosaic_0001>
module attributes {stable_mosaic.version = 11 : i64} {
  func.func @_feb_f_kernel(%arg0: i32, %arg1: i32, %arg2: memref<2x16x256xf32, #tpu.memory_space<vmem>>, %arg3: memref<8x16xf32, #tpu.memory_space<vmem>>, %arg4: memref<8x256x256xbf16, #tpu.memory_space<vmem>>, %arg5: memref<1x64x16xf32, #tpu.memory_space<vmem>>, %arg6: memref<2x64x128xf32, #tpu.memory_space<vmem>>) attributes {dimension_semantics = [#tpu.dimension_semantics<parallel>, #tpu.dimension_semantics<arbitrary>], iteration_bounds = array<i64: 2, 2>, scalar_prefetch = 0 : i64, scratch_operands = 0 : i64, tpu.core_type = #tpu.core_type<tc>, window_params = [{transform_indices = @transform_0, window_bounds = array<i64: 2, 16, 256>}, {transform_indices = @transform_1, window_bounds = array<i64: 8, 16>}, {transform_indices = @transform_2, window_bounds = array<i64: 8, 256, 256>}, {transform_indices = @transform_3, window_bounds = array<i64: 1, 64, 16>}, {transform_indices = @transform_4, window_bounds = array<i64: 2, 64, 128>}]} {
    %c0_i32 = arith.constant 0 : i32
    %0 = arith.cmpi eq, %arg1, %c0_i32 : i32
    %1 = arith.extui %0 : i1 to i32
    %c0_i32_0 = arith.constant 0 : i32
    %2 = arith.cmpi ne, %1, %c0_i32_0 : i32
    scf.if %2 {
      %cst_29 = arith.constant 0.000000e+00 : f32
      %42 = vector.broadcast %cst_29 : f32 to vector<2x64x128xf32>
      %c0_30 = arith.constant 0 : index
      %c0_31 = arith.constant 0 : index
      %c0_32 = arith.constant 0 : index
      %43 = vector.load %arg6[%c0_30, %c0_31, %c0_32] : memref<2x64x128xf32, #tpu.memory_space<vmem>>, vector<2x64x128xf32>
      tpu.vector_store %arg6[%c0_30, %c0_31, %c0_32], %42 {strides = array<i32>} : memref<2x64x128xf32, #tpu.memory_space<vmem>>, vector<2x64x128xf32>,
    } else {
    }
    %c0 = arith.constant 0 : index
    %c0_1 = arith.constant 0 : index
    %3 = vector.load %arg3[%c0, %c0_1] : memref<8x16xf32, #tpu.memory_space<vmem>>, vector<8x16xf32>
    %c0_2 = arith.constant 0 : index
    %c0_3 = arith.constant 0 : index
    %c0_4 = arith.constant 0 : index
    %4 = vector.load %arg2[%c0_2, %c0_3, %c0_4] : memref<2x16x256xf32, #tpu.memory_space<vmem>>, vector<1x16x256xf32>
    %5 = vector.shape_cast %4 : vector<1x16x256xf32> to vector<16x256xf32>
    %cst = arith.constant dense<0.000000e+00> : vector<8x256xf32>
    %6 = tpu.matmul %3, %5, %cst {dimension_numbers = #tpu.dot_dimension_numbers<[1], [0], [0], [1], [0, 0, 1, 1], [], []>} : vector<8x16xf32>, vector<16x256xf32>, vector<8x256xf32> -> vector<8x256xf32>
    %c1 = arith.constant 1 : index
    %c0_5 = arith.constant 0 : index
    %c0_6 = arith.constant 0 : index
    %7 = vector.load %arg2[%c1, %c0_5, %c0_6] : memref<2x16x256xf32, #tpu.memory_space<vmem>>, vector<1x16x256xf32>
    %8 = vector.shape_cast %7 : vector<1x16x256xf32> to vector<16x256xf32>
    %cst_7 = arith.constant dense<0.000000e+00> : vector<8x256xf32>
    %9 = tpu.matmul %3, %8, %cst_7 {dimension_numbers = #tpu.dot_dimension_numbers<[1], [0], [0], [1], [0, 0, 1, 1], [], []>} : vector<8x16xf32>, vector<16x256xf32>, vector<8x256xf32> -> vector<8x256xf32>
    %10 = vector.shape_cast %6 : vector<8x256xf32> to vector<8x1x256xf32>
    %11 = vector.shape_cast %9 : vector<8x256xf32> to vector<8x1x256xf32>
    %12 = tpu.concatenate %10, %11 in 1 : vector<8x1x256xf32>, vector<8x1x256xf32> -> vector<8x2x256xf32>
    %13 = arith.truncf %12 : vector<8x2x256xf32> to vector<8x2x256xbf16>
    %c0_8 = arith.constant 0 : index
    %c0_9 = arith.constant 0 : index
    %c0_10 = arith.constant 0 : index
    %14 = vector.load %arg4[%c0_8, %c0_9, %c0_10] : memref<8x256x256xbf16, #tpu.memory_space<vmem>>, vector<8x256x256xbf16>
    %cst_11 = arith.constant dense<0.000000e+00> : vector<8x2x256xf32>
    %15 = tpu.matmul %13, %14, %cst_11 {dimension_numbers = #tpu.dot_dimension_numbers<[2], [1], [1], [2], [0, 0, 0, 1, 1, 2], [0], [0]>} : vector<8x2x256xbf16>, vector<8x256x256xbf16>, vector<8x2x256xf32> -> vector<8x2x256xf32>
    %c0_12 = arith.constant 0 : index
    %c0_13 = arith.constant 0 : index
    %c0_14 = arith.constant 0 : index
    %16 = vector.load %arg5[%c0_12, %c0_13, %c0_14] : memref<1x64x16xf32, #tpu.memory_space<vmem>>, vector<1x64x16xf32>
    %17 = vector.shape_cast %16 : vector<1x64x16xf32> to vector<64x16xf32>
    %18 = vector.extract_strided_slice %15 {offsets = [0, 0, 0], sizes = [8, 1, 256], strides = [1, 1, 1]} : vector<8x2x256xf32> to vector<8x1x256xf32>
    %19 = vector.shape_cast %18 : vector<8x1x256xf32> to vector<8x256xf32>
    %20 = vector.extract_strided_slice %19 {offsets = [0, 0], sizes = [8, 128], strides = [1, 1]} : vector<8x256xf32> to vector<8x128xf32>
    %21 = vector.extract_strided_slice %19 {offsets = [0, 128], sizes = [8, 128], strides = [1, 1]} : vector<8x256xf32> to vector<8x128xf32>
    %22 = tpu.concatenate %20, %21 in 0 : vector<8x128xf32>, vector<8x128xf32> -> vector<16x128xf32>
    %c0_15 = arith.constant 0 : index
    %c0_16 = arith.constant 0 : index
    %c0_17 = arith.constant 0 : index
    %23 = vector.load %arg6[%c0_15, %c0_16, %c0_17] : memref<2x64x128xf32, #tpu.memory_space<vmem>>, vector<1x64x128xf32>
    %24 = vector.shape_cast %23 : vector<1x64x128xf32> to vector<64x128xf32>
    %cst_18 = arith.constant dense<0.000000e+00> : vector<64x128xf32>
    %25 = tpu.matmul %17, %22, %cst_18 {dimension_numbers = #tpu.dot_dimension_numbers<[1], [0], [0], [1], [0, 0, 1, 1], [], []>} : vector<64x16xf32>, vector<16x128xf32>, vector<64x128xf32> -> vector<64x128xf32>
    %26 = arith.addf %24, %25 : vector<64x128xf32>
    %c0_19 = arith.constant 0 : index
    %c0_20 = arith.constant 0 : index
    %c0_21 = arith.constant 0 : index
    %27 = vector.load %arg6[%c0_19, %c0_20, %c0_21] : memref<2x64x128xf32, #tpu.memory_space<vmem>>, vector<1x64x128xf32>
    %28 = vector.shape_cast %27 : vector<1x64x128xf32> to vector<64x128xf32>
    %29 = vector.shape_cast %26 : vector<64x128xf32> to vector<1x64x128xf32>
    tpu.vector_store %arg6[%c0_19, %c0_20, %c0_21], %29 {strides = array<i32>} : memref<2x64x128xf32, #tpu.memory_space<vmem>>, vector<1x64x128xf32>,
    %30 = vector.extract_strided_slice %15 {offsets = [0, 1, 0], sizes = [8, 1, 256], strides = [1, 1, 1]} : vector<8x2x256xf32> to vector<8x1x256xf32>
    %31 = vector.shape_cast %30 : vector<8x1x256xf32> to vector<8x256xf32>
    %32 = vector.extract_strided_slice %31 {offsets = [0, 0], sizes = [8, 128], strides = [1, 1]} : vector<8x256xf32> to vector<8x128xf32>
    %33 = vector.extract_strided_slice %31 {offsets = [0, 128], sizes = [8, 128], strides = [1, 1]} : vector<8x256xf32> to vector<8x128xf32>
    %34 = tpu.concatenate %32, %33 in 0 : vector<8x128xf32>, vector<8x128xf32> -> vector<16x128xf32>
    %c1_22 = arith.constant 1 : index
    %c0_23 = arith.constant 0 : index
    %c0_24 = arith.constant 0 : index
    %35 = vector.load %arg6[%c1_22, %c0_23, %c0_24] : memref<2x64x128xf32, #tpu.memory_space<vmem>>, vector<1x64x128xf32>
    %36 = vector.shape_cast %35 : vector<1x64x128xf32> to vector<64x128xf32>
    %cst_25 = arith.constant dense<0.000000e+00> : vector<64x128xf32>
    %37 = tpu.matmul %17, %34, %cst_25 {dimension_numbers = #tpu.dot_dimension_numbers<[1], [0], [0], [1], [0, 0, 1, 1], [], []>} : vector<64x16xf32>, vector<16x128xf32>, vector<64x128xf32> -> vector<64x128xf32>
    %38 = arith.addf %36, %37 : vector<64x128xf32>
    %c1_26 = arith.constant 1 : index
    %c0_27 = arith.constant 0 : index
    %c0_28 = arith.constant 0 : index
    %39 = vector.load %arg6[%c1_26, %c0_27, %c0_28] : memref<2x64x128xf32, #tpu.memory_space<vmem>>, vector<1x64x128xf32>
    %40 = vector.shape_cast %39 : vector<1x64x128xf32> to vector<64x128xf32>
    %41 = vector.shape_cast %38 : vector<64x128xf32> to vector<1x64x128xf32>
    tpu.vector_store %arg6[%c1_26, %c0_27, %c0_28], %41 {strides = array<i32>} : memref<2x64x128xf32, #tpu.memory_space<vmem>>, vector<1x64x128xf32>,
    return
  }
  func.func @transform_0(%arg0: i32, %arg1: i32) -> (i32, i32, i32) {
    %c0_i32 = arith.constant 0 : i32
    %c0_i32_0 = arith.constant 0 : i32
    %c0_i32_1 = arith.constant 0 : i32
    %c0_i32_2 = arith.constant 0 : i32
    return %c0_i32, %c0_i32_0, %c0_i32_1 : i32, i32, i32
  }
  func.func @transform_1(%arg0: i32, %arg1: i32) -> (i32, i32) {
    %c2_i32 = arith.constant 2 : i32
    %0 = arith.muli %arg0, %c2_i32 : i32
    %1 = arith.addi %0, %arg1 : i32
    %c0_i32 = arith.constant 0 : i32
    %c0_i32_0 = arith.constant 0 : i32
    return %1, %c0_i32 : i32, i32
  }
  func.func @transform_2(%arg0: i32, %arg1: i32) -> (i32, i32, i32) {
    %c2_i32 = arith.constant 2 : i32
    %0 = arith.muli %arg0, %c2_i32 : i32
    %1 = arith.addi %0, %arg1 : i32
    %c0_i32 = arith.constant 0 : i32
    %c0_i32_0 = arith.constant 0 : i32
    %c0_i32_1 = arith.constant 0 : i32
    return %1, %c0_i32, %c0_i32_0 : i32, i32, i32
  }
  func.func @transform_3(%arg0: i32, %arg1: i32) -> (i32, i32, i32) {
    %c0_i32 = arith.constant 0 : i32
    %c0_i32_0 = arith.constant 0 : i32
    %c0_i32_1 = arith.constant 0 : i32
    return %arg1, %c0_i32, %c0_i32_0 : i32, i32, i32
  }
  func.func @transform_4(%arg0: i32, %arg1: i32) -> (i32, i32, i32) {
    %c0_i32 = arith.constant 0 : i32
    %c0_i32_0 = arith.constant 0 : i32
    %c0_i32_1 = arith.constant 0 : i32
    return %c0_i32, %c0_i32_0, %arg0 : i32, i32, i32
  }
}

</mosaic_0001>

<bundles_post_ra>
// kernel: tpu_custom_call.1
= control target key start
LH: loop header
LB: loop body
LE: loop exit
PB: predicated region body
PF: predicated region fallthrough
CT: control target
= control target key end

     0   :  { %9 = vsyncpa [#allocation3], 0  ;;  %s5047_s0 = inlined_call_operand.hbm [shape: f32[2,64,256], index: 0, kind: input, shape index: {}]   ;;  %s5048_s1 = inlined_call_operand.vmem [shape: f32[32,16], index: 1, kind: input, shape index: {}]   ;;  %s5049_s2 = inlined_call_operand.hbm [shape: bf16[32,256,256], index: 2, kind: input, shape index: {}]   ;;  %s5050_s3 = inlined_call_operand.vmem [shape: f32[2,64,16], index: 3, kind: input, shape index: {}]   ;;  %s5051_s4 = inlined_call_operand.hbm [shape: f32[2,64,256], index: 4, kind: output, shape index: {}]  }
   0x1   :  { %10 = vsyncpa [#allocation6], 0 }
   0x2   :  { %12 = vsyncpa [#allocation6 + $0x1], 0 }
   0x3   :  { %13 = vsyncpa [#allocation4], 0 }
   0x4   :  { %15 = vsyncpa [#allocation4 + $0x1], 0  ;;  %s4281_s15 = smov 0   ;;  %s4283_s16 = smov 0  }
   0x5   :  { %s4285_s17 = smov 0   ;;  %s4287_s18 = smov 0  }
   0x6   :  { %s4289_s19 = smov 0   ;;  %s4291_s20 = smov 0  }
   0x7   :  { %s4293_s21 = smov 0   ;;  %s4295_s22 = smov 0  }
   0x8   :  { %s4297_s23 = smov 0   ;;  %s4299_s24 = smov 0  }
   0x9   :  { %s4301_s25 = smov 0  }
   0xa LB: > { %5061 = sst [smem:[#allocation14_spill]] %s4204_s17  ;;  %s3175_s26 = sadd.s32 4294967295, %s4236_s25   ;;  %s4236_s25 = sphi %s4301_s25, %s21_s25   ;;  %s4232_s24 = sphi %s4299_s24, %s5086_s24   ;;  %s4228_s23 = sphi %s4297_s23, %s5085_s23   ;;  %s4224_s22 = sphi %s4295_s22, %s5092_s22   ;;  %s4220_s21 = sphi %s4293_s21, %s5083_s21   ;;  %s4216_s20 = sphi %s4291_s20, %s5091_s20   ;;  %s4212_s19 = sphi %s4289_s19, %s5090_s19   ;;  %s4208_s18 = sphi %s4287_s18, %s5089_s18   ;;  %s4204_s17 = sphi %s4285_s17, %s5081_s17   ;;  %s4200_s16 = sphi %s4283_s16, %s5088_s16   ;;  %s4196_s15 = sphi %s4281_s15, %s5087_s15  }
   0xb   : > { %5062 = sst [smem:[#allocation15_spill]] %s4228_s23  ;;  %s30_s28 = sadd.s32 1, %s4228_s23 }
   0xc   : > { %5063 = sst [smem:[#allocation16_spill]] %s4232_s24  ;;  %s33_s29 = sadd.s32 1, %s4232_s24 }
   0xd   : > { %p31_p0 = scmp.ge.s32.totalorder %s30_s28, 2  ;;  %s3179_s30 = sshll.u32 %s4232_s24, 1 }
   0xe   : > { %s4340_s5 = sadd.s32 %s4228_s23, %s3179_s30  ;;  %s95_s6 = sadd.s32 1, %s4216_s20 }
   0xf   : > { %s5094_s28 = smov (%p31_p0, %s30_s28), 0  ;;  %s5096_s29 = smov (!%p31_p0, %s33_s29), %s4232_s24 }
  0x10   : > { %5064 = sst [smem:[#allocation17_spill]] %s5094_s28  ;;  %p102_p1 = scmp.ne.s32.totalorder %s4216_s20, %s4212_s19 }
  0x11   : > { %p103_p2 = scmp.eq.s32.totalorder %s4236_s25, 0  ;;  %p35_p3 = scmp.ge.s32.totalorder %s5096_s29, 2 }
  0x12   : > { %p108_p4 = scmp.ne.s32.totalorder %s4212_s19, %s4208_s18  ;;  %p4354_p6 = scmp.eq.s32.totalorder %s3175_s26, 0 }
  0x13   : > { %p4350_p5 = por %p103_p2, %p102_p1  ;;  %s5098_s29 = smov (%p35_p3, %s5096_s29), 0 }
  0x14   : > { %s5066_s8 = scalar_select %p4354_p6, 1, 0 }
  0x15   : > { %5067 = sst [smem:[#allocation18_spill]] %s5098_s29  ;;  %p4362_p7 = por %p4354_p6, %p108_p4 }
  0x16   : > { %s147_s10 = sadd.s32 1, %s4204_s17  ;;  %s3180_s11 = sshll.u32 %s5098_s29, 1 }
  0x17   : > { %s5068_s9 = scalar_select %p4362_p7, 1, 0 }
  0x18   : > { %s144_s12 = ssub.s32 %s4232_s24, %s5098_s29  ;;  %s91_s13 = sadd.s32 %s3180_s11, %s5094_s28 }
  0x19   : > { %p145_p8 = scmp.eq.s32.totalorder %s144_s12, 0  ;;  %s92_s14 = ssub.s32 %s4340_s5, %s91_s13 }
  0x1a   : > { %p157_p9 = scmp.ne.s32.totalorder %s4204_s17, %s4200_s16  ;;  %p93_p10 = scmp.eq.s32.totalorder %s92_s14, 0 }
  0x1b   : > { %p158_p11 = scmp.eq.s32.totalorder %s3175_s26, 3  ;;  %p163_p13 = scmp.ne.s32.totalorder %s4200_s16, %s4196_s15 }
  0x1c   : > { %s4375_s18 = scalar_select %p145_p8, %s4204_s17, %s147_s10  }
  0x1d   : > { %s4378_s30 = scalar_select %p93_p10, %s4216_s20, %s95_s6  }
  0x1e   : > { %5069 = sst [smem:[#allocation19_spill]] %s4375_s18  ;;  %p4380_p12 = por %p158_p11, %p157_p9 }
  0x1f   : > { %5070 = sst [smem:[#allocation20_spill]] %s4378_s30  ;;  %s5072_s23 = sadd.s32 4294967294, %s4236_s25  }
  0x20   : > { %s5071_s27 = scalar_select %p4380_p12, 1, 0 }
  0x21   : > { %p164_p0 = scmp.eq.s32.totalorder %s5072_s23, 3  ;;  %p3181_p1 = scmp.ge.s32.totalorder %s4236_s25, 1 }
  0x22   : > { %p171_p2 = scmp.lt.s32.totalorder %s4236_s25, 5 }
  0x23   : > { %p4390_p3 = por %p164_p0, %p163_p13 }
  0x24   : > { %p4394_p4 = pnand %p3181_p1, %p171_p2 }
  0x25   : > { %s5073_s11 = scalar_select %p4390_p3, 1, 0 }
  0x26   : > { %175 = sbr.rel (%p4394_p4) target bundleno = 56 (0x38), region = 12 }
  0x2d   : > { %s3566_s23 = scalar_select %p4354_p6, [#allocation0], [#allocation10] }
  0x2e   : > { %s4238_s6 = smov [#allocation2]   ;;  %s4239_s13 = smov 2048  }
  0x2f   : > { %s187_s26 = sld [smem:[%s3566_s23]]   ;;  %s195_s10 = sshll.u32 %s4238_s6, 4  ;;  %s196_s10 = int_to_ptr.vmem [resolvable:$true] %s195_s10 }
  0x30   : > { %3567 = sst [smem:[#allocation9]] (%p4354_p6), %s4239_s13  ;;  %s4240_s14 = smov 512  }
  0x31   : > { %3568 = sst [smem:[#allocation9 + $0x1]] (%p4354_p6), %s4240_s14  ;;  %s4241_s29 = smov 2  }
  0x32   : > { %3569 = sst [smem:[#allocation9 + $0x2]] (%p4354_p6), %s4241_s29  ;;  %s4242_s28 = smov 256  }
  0x33   : > { %3570 = sst [smem:[#allocation9 + $0x3]] (%p4354_p6), %s4242_s28  ;;  %s4243_s30 = smov 16  }
  0x34   : > { %3571 = sst [smem:[#allocation9 + $0x4]] (%p4354_p6), %s4242_s28  ;;  %s4244_s6 = smov [#allocation3]  }
  0x35   : > { %s3183_s24 = sshll.u32 %s187_s26, 26  ;;  %3572 = sst [smem:[#allocation9 + $0x5]] (%p4354_p6), %s4243_s30 }
  0x36   : > { %s3184_s23 = sadd.s32 134217728, %s3183_s24  ;;  %s4245_s18 = smov [#allocation8]  }
  0x37   : > { %3573 = dma.general (%p4354_p6), %s5047_s0, 1024, %s196_s10, %s4244_s6, %s4245_s18, [#allocation9], %s3184_s23, 0  }
  0x38 PF: > { %p3589_p8 = scmp.lt.s32.totalorder %s4236_s25, 4  ;;  %s233_s29 = sand.u32 1, %s4216_s20  }
  0x39   : > { %s3495_s26 = sshll.u32 %s4340_s5, 15  ;;  %s3186_s28 = sshll.u32 %s233_s29, 11 }
  0x3a   : > { %s4425_s30 = scalar_lea.hbm %s5049_s2, %s3495_s26  ;;  %s237_s17 = scalar_lea.vmem [#allocation5], %s3186_s28 }
  0x3b   : > { %s247_s18 = sshll.u32 %s237_s17, 4  ;;  %p4429_p9 = pnand %p3589_p8, %p4350_p5  ;;  %s4433_s18 = int_to_ptr.vmem [resolvable:$true] %s247_s18 }
  0x3c   : > { %s4435_s5 = scalar_lea.sflag [#allocation6], %s233_s29  ;;  %s4080_s23 = scalar_lea.hbm %s4425_s30, 32768 }
  0x3d   : > { %p4081_p10 = scmp.ne.s32.totalorder %s4425_s30, %s4080_s23  ;;  %p4082_p11 = pneg %p4429_p9 }
  0x3e   : > { %s4085_s13 = scalar_lea.hbm %s5049_s2, 131072  ;;  %p4086_p5 = scmp.lt.u32.totalorder %s4425_s30, %s5049_s2 }
  0x3f   : > { %p4083_p13 = pnand %p4082_p11, %p4081_p10  ;;  %p4087_p1 = scmp.lt.u32.totalorder %s4085_s13, %s4080_s23 }
  0x40   : > { %p4089_p8 = scmp.lt.u32.totalorder %s4080_s23, %s4425_s30 }
  0x41   : > { %p4084_p0 = pneg %p4083_p13  ;;  %p4088_p2 = por %p4087_p1, %p4086_p5 }
  0x43   : > { %p4090_p3 = por %p4089_p8, %p4088_p2 }
  0x45   : > { %p4091_p12 = pnand %p4090_p3, %p4084_p0 }
  0x47   : > { %4094 = shalt.err (!%p4091_p12)
}
  0x48   : > { %s4095_s29 = scalar_lea.vmem %s4433_s18, 32768  ;;  %s4246_s24 = smov [#allocation5]  }
  0x49   : > { %p4096_p10 = scmp.ne.s32.totalorder %s4433_s18, %s4095_s29  ;;  %s4100_s14 = sshll.u32 %s4246_s24, 4  ;;  %s4101_s14 = int_to_ptr.vmem [resolvable:$false] %s4100_s14 }
  0x4a   : > { %s4102_s17 = scalar_lea.vmem %s4101_s14, 65536  ;;  %p4103_p6 = scmp.lt.s32.totalorder %s4433_s18, %s4101_s14 }
  0x4b   : > { %p4098_p13 = pnand %p4096_p10, %p4082_p11  ;;  %p4104_p5 = scmp.lt.s32.totalorder %s4102_s17, %s4095_s29 }
  0x4d   : > { %p4099_p7 = pneg %p4098_p13  ;;  %p4105_p1 = por %p4104_p5, %p4103_p6 }
  0x4f   : > { %p4106_p2 = pnand %p4105_p1, %p4099_p7 }
  0x51   : > { %4109 = shalt.err (!%p4106_p2)
}
  0x52   : > { %s4247_s23 = smov 128   ;;  %s4248_s6 = smov 8  }
  0x53   : > { %3583 = dma.hbm_to_vmem [thread:$0]  (!%p4429_p9), %s4425_s30, 32768, %s4433_s18, %s4435_s5, %s4247_s23, %s4247_s23, %s4248_s6  }
  0x54   : > { %267 = sbr.rel (%p4394_p4) target bundleno = 1004 (0x3ec), region = 36  ;;  %p5076_p12 = scmp.ne.s32.totalorder (!%p4394_p4), %s5066_s8, 0 }
  0x5b   : > { %4183 = dma.done.wait (%p5076_p12), [#allocation3], 1024  }
  0x5c   : > { %4185 = vsyncadd (%p5076_p12), [#allocation3], 4294966272  ;;  %s273_s7 = sand.u32 1, %s4212_s19   ;;  %p5077_p6 = scmp.ne.s32.totalorder %s5068_s9, 0 }
  0x5d   : > { %s3193_s13 = sshll.u32 %s273_s7, 11  ;;  %s274_s26 = scalar_lea.sflag [#allocation6], %s273_s7 }
  0x5e   : > { %s4470_s28 = scalar_lea.vmem [#allocation5], %s3193_s13 }
  0x5f   : > { %4187 = dma.done.wait (%p5077_p6), %s274_s26, 32768  }
  0x60   : > { %4189 = vsyncadd (%p5077_p6), %s274_s26, 4294934528  ;;  %s310_s8 = sand.u32 1, %s4200_s16   ;;  %s3195_s12 = sshll.u32 %s4224_s22, 1 }
  0x61   : > { %s3194_s30 = sshll.u32 %s310_s8, 7  ;;  %s314_s18 = sadd.s32 %s4220_s21, %s3195_s12 }
  0x62   : > { %p315_p7 = scmp.lt.s32.totalorder %s314_s18, 3  ;;  %p324_p3 = scmp.lt.s32.totalorder %s4220_s21, 1 }
  0x63   : > { %s4493_s7 = scalar_lea.vmem [#allocation7], %s3194_s30  ;;  %p3199_p4 = scmp.ne.s32.totalorder %s4220_s21, 0 }
  0x64   : > { %s5100_s18 = smov (!%p315_p7, %s314_s18), 3  ;;  %v4249_v0 = vmov (!%p3199_p4), 0.0  }
  0x65   : > { %s325_s10 = scalar_select %p324_p3, %s4220_s21, 1 }
  0x66   : > { %s3196_s5 = sshll.u32 %s5100_s18, 3  ;;  %332 = sbr.rel (%p3199_p4) target bundleno = 110 (0x6e), region = 48  ;;  %333 = vst [vmem:[%s4493_s7] sm:$0xff] (!%p3199_p4), %v4249_v0  ;;  %334 = vst [vmem:[%s4493_s7 + $0x8] sm:$0xff] (!%p3199_p4), %v4249_v0 }
  0x67   : > { %s4486_s9 = scalar_lea.vmem %s5048_s1, %s3196_s5  ;;  %s3496_s14 = sshll.u32 %s325_s10, 6  ;;  %335 = vst [vmem:[%s4493_s7 + $0x10] sm:$0xff] (!%p3199_p4), %v4249_v0  ;;  %336 = vst [vmem:[%s4493_s7 + $0x18] sm:$0xff] (!%p3199_p4), %v4249_v0 }
  0x68   : > { %s4491_s6 = scalar_lea.vmem %s5050_s3, %s3496_s14  ;;  %337 = vst [vmem:[%s4493_s7 + $0x20] sm:$0xff] (!%p3199_p4), %v4249_v0  ;;  %338 = vst [vmem:[%s4493_s7 + $0x28] sm:$0xff] (!%p3199_p4), %v4249_v0 }
  0x69   : > { %339 = vst [vmem:[%s4493_s7 + $0x30] sm:$0xff] (!%p3199_p4), %v4249_v0  ;;  %340 = vst [vmem:[%s4493_s7 + $0x38] sm:$0xff] (!%p3199_p4), %v4249_v0 }
  0x6a   : > { %341 = vst [vmem:[%s4493_s7 + $0x40] sm:$0xff] (!%p3199_p4), %v4249_v0  ;;  %342 = vst [vmem:[%s4493_s7 + $0x48] sm:$0xff] (!%p3199_p4), %v4249_v0 }
  0x6b   : > { %343 = vst [vmem:[%s4493_s7 + $0x50] sm:$0xff] (!%p3199_p4), %v4249_v0  ;;  %344 = vst [vmem:[%s4493_s7 + $0x58] sm:$0xff] (!%p3199_p4), %v4249_v0 }
  0x6c   : > { %345 = vst [vmem:[%s4493_s7 + $0x60] sm:$0xff] (!%p3199_p4), %v4249_v0  ;;  %346 = vst [vmem:[%s4493_s7 + $0x68] sm:$0xff] (!%p3199_p4), %v4249_v0 }
  0x6d   : > { %347 = vst [vmem:[%s4493_s7 + $0x70] sm:$0xff] %v4249_v0  ;;  %348 = vst [vmem:[%s4493_s7 + $0x78] sm:$0xff] %v4249_v0 }
  0x6e PF: > { %v351_v1 = vld [vmem:[#allocation2 + $0x8] sm:$0xff]  ;;  %v353_v2 = vld [vmem:[#allocation2 + $0x18] sm:$0xff]  ;;  %v350_v6 = vld [vmem:[#allocation2] sm:$0xff]  ;;  %v4250_v8 = vmov 0.0   ;;  %vm354_vm0 = vcmask 130048   ;;  %vm769_vm1 = vcmask 1040384  }
  0x6f   : > { %v431_v3 = vld [vmem:[#allocation2 + $0x28] sm:$0xff]  ;;  %v3549_v4 = vpack.c.bf16 %v353_v2, %v351_v1  ;;  %v433_v5 = vld [vmem:[#allocation2 + $0x38] sm:$0xff]  ;;  %v352_v7 = vld [vmem:[#allocation2 + $0x10] sm:$0xff]  ;;  %422 = vmatprep.mubr.f32.mxu0 %v4250_v8  ;;  %498 = vmatprep.mubr.f32.mxu1 %v4250_v8  ;;  %vm2683_vm2 = vcmask 1041409   ;;  %vm2686_vm3 = vcmask 1042434   ;;  %vm2689_vm4 = vcmask 1043459  }
  0x70   : > { %v3553_v9 = vpack.c.bf16 %v433_v5, %v431_v3  ;;  %v3551_v10 = vpack.c.bf16 %v352_v7, %v350_v6  ;;  %v430_v11 = vld [vmem:[#allocation2 + $0x20] sm:$0xff]  ;;  %v432_v12 = vld [vmem:[#allocation2 + $0x30] sm:$0xff]  ;;  %vm2692_vm5 = vcmask 1044484   ;;  %vm2695_vm6 = vcmask 1045509   ;;  %s3491_s21 = sshll.u32 %s4224_s22, 7  ;;  %s3053_s13 = sshll.u32 %s4493_s7, 4  ;;  %s4978_s13 = int_to_ptr.vmem [resolvable:$true] %s3053_s13 }
  0x71   : > { %v349_v13 = vld [vmem:[%s4486_s9] sm:$0xff]  ;;  %3550 = vmatprep.subr.bf16.mxu0 %v3549_v4  ;;  %v3555_v14 = vpack.c.bf16 %v432_v12, %v430_v11  ;;  %v3704_v19 = vld [vmem:[%s4470_s28 + $0x14] ss:$8 sps:$4 sm:$0xff]   ;;  %v3702_v20 = vld [vmem:[%s4470_s28 + $0x10] ss:$8 sps:$4 sm:$0xff]   ;;  %vm2698_vm7 = vcmask 1046534  }
  0x72   : > { %v3696_v15 = vld [vmem:[%s4470_s28] ss:$8 sps:$4 sm:$0xff]   ;;  %3554 = vmatprep.subr.bf16.mxu1 %v3553_v9  ;;  %3552 = vmatpush1.bf16.msra.mxu0 %v3551_v10  ;;  %v3698_v16 = vld [vmem:[%s4470_s28 + $0x4] ss:$8 sps:$4 sm:$0xff]   ;;  %v3707_v21 = vld [vmem:[%s4470_s28 + $0x114] ss:$8 sps:$4 sm:$0xff]  }
  0x73   : > { %3556 = vmatpush1.bf16.msra.mxu1 %v3555_v14  ;;  %v3699_v17 = vld [vmem:[%s4470_s28 + $0x100] ss:$8 sps:$4 sm:$0xff]   ;;  %v3701_v18 = vld [vmem:[%s4470_s28 + $0x104] ss:$8 sps:$4 sm:$0xff]   ;;  %1218 = vmatprep.subr.bf16.mxu0 %v3698_v16  ;;  %v3705_v22 = vld [vmem:[%s4470_s28 + $0x110] ss:$8 sps:$4 sm:$0xff]  }
  0x74   : > { %1419 = vmatprep.subr.bf16.mxu1 %v3701_v18  ;;  %v3710_v23 = vld [vmem:[%s4470_s28 + $0x24] ss:$8 sps:$4 sm:$0xff]   ;;  %v3708_v25 = vld [vmem:[%s4470_s28 + $0x20] ss:$8 sps:$4 sm:$0xff]   ;;  %v3716_v27 = vld [vmem:[%s4470_s28 + $0x34] ss:$8 sps:$4 sm:$0xff]  }
  0x75   : > { %3200 = vmatmul.mubr.msk.f32.vlgmr.msra.gmra.mrb[0].mxu0 %vm354_vm0, %v349_v13  ;;  %v3713_v24 = vld [vmem:[%s4470_s28 + $0x124] ss:$8 sps:$4 sm:$0xff]   ;;  %v3711_v26 = vld [vmem:[%s4470_s28 + $0x120] ss:$8 sps:$4 sm:$0xff]   ;;  %v3719_v28 = vld [vmem:[%s4470_s28 + $0x134] ss:$8 sps:$4 sm:$0xff]  }
  0x76   : > { %3201 = vmatmul.mubr.msk.f32.vlgmr.msra.gmra.mrb[0].mxu1 %vm354_vm0, %v349_v13  ;;  %1219 = vmatpush1.bf16.msra.mxu0 %v3696_v15  ;;  %v3714_v29 = vld [vmem:[%s4470_s28 + $0x30] ss:$8 sps:$4 sm:$0xff]   ;;  %v3722_v31 = vld [vmem:[%s4470_s28 + $0x44] ss:$8 sps:$4 sm:$0xff]   ;;  %v3720_v33 = vld [vmem:[%s4470_s28 + $0x40] ss:$8 sps:$4 sm:$0xff]  }
  0x77   : > { %1420 = vmatpush1.bf16.msra.mxu1 %v3699_v17  ;;  %1220 = vmatprep.subr.bf16.mxu0 %v3704_v19  ;;  %v3717_v30 = vld [vmem:[%s4470_s28 + $0x130] ss:$8 sps:$4 sm:$0xff]   ;;  %v3725_v32 = vld [vmem:[%s4470_s28 + $0x144] ss:$8 sps:$4 sm:$0xff]   ;;  %v3723_v34 = vld [vmem:[%s4470_s28 + $0x140] ss:$8 sps:$4 sm:$0xff]   ;;  %v512_v19 = vlaneseq }
  0x78   : > { %1421 = vmatprep.subr.bf16.mxu1 %v3707_v21  ;;  %v3728_v35 = vld [vmem:[%s4470_s28 + $0x54] ss:$8 sps:$4 sm:$0xff]   ;;  %v3726_v37 = vld [vmem:[%s4470_s28 + $0x50] ss:$8 sps:$4 sm:$0xff]   ;;  %v3734_v39 = vld [vmem:[%s4470_s28 + $0x64] ss:$8 sps:$4 sm:$0xff]  }
  0x79   : > { %v3731_v36 = vld [vmem:[%s4470_s28 + $0x154] ss:$8 sps:$4 sm:$0xff]   ;;  %v3729_v38 = vld [vmem:[%s4470_s28 + $0x150] ss:$8 sps:$4 sm:$0xff]   ;;  %v3737_v40 = vld [vmem:[%s4470_s28 + $0x164] ss:$8 sps:$4 sm:$0xff]  }
  0x7a   : > { %1221 = vmatpush1.bf16.msra.mxu0 %v3702_v20  ;;  %v3732_v41 = vld [vmem:[%s4470_s28 + $0x60] ss:$8 sps:$4 sm:$0xff]   ;;  %v3740_v43 = vld [vmem:[%s4470_s28 + $0x74] ss:$8 sps:$4 sm:$0xff]   ;;  %v3738_v45 = vld [vmem:[%s4470_s28 + $0x70] ss:$8 sps:$4 sm:$0xff]  }
  0x7b   : > { %1422 = vmatpush1.bf16.msra.mxu1 %v3705_v22  ;;  %1222 = vmatprep.subr.bf16.mxu0 %v3710_v23  ;;  %v3735_v42 = vld [vmem:[%s4470_s28 + $0x160] ss:$8 sps:$4 sm:$0xff]   ;;  %v3743_v44 = vld [vmem:[%s4470_s28 + $0x174] ss:$8 sps:$4 sm:$0xff]   ;;  %v3741_v46 = vld [vmem:[%s4470_s28 + $0x170] ss:$8 sps:$4 sm:$0xff]  }
  0x7c   : > { %1423 = vmatprep.subr.bf16.mxu1 %v3713_v24  ;;  %v3746_v47 = vld [vmem:[%s4470_s28 + $0x84] ss:$8 sps:$4 sm:$0xff]   ;;  %v3744_v49 = vld [vmem:[%s4470_s28 + $0x80] ss:$8 sps:$4 sm:$0xff]   ;;  %v3752_v51 = vld [vmem:[%s4470_s28 + $0x94] ss:$8 sps:$4 sm:$0xff]  }
  0x7d   : > { %v3749_v48 = vld [vmem:[%s4470_s28 + $0x184] ss:$8 sps:$4 sm:$0xff]   ;;  %v3747_v50 = vld [vmem:[%s4470_s28 + $0x180] ss:$8 sps:$4 sm:$0xff]   ;;  %v3755_v52 = vld [vmem:[%s4470_s28 + $0x194] ss:$8 sps:$4 sm:$0xff]  }
  0x7e   : > { %1223 = vmatpush1.bf16.msra.mxu0 %v3708_v25  ;;  %v3750_v53 = vld [vmem:[%s4470_s28 + $0x90] ss:$8 sps:$4 sm:$0xff]   ;;  %v3758_v55 = vld [vmem:[%s4470_s28 + $0xa4] ss:$8 sps:$4 sm:$0xff]   ;;  %v3756_v57 = vld [vmem:[%s4470_s28 + $0xa0] ss:$8 sps:$4 sm:$0xff]  }
  0x7f   : > { %1424 = vmatpush1.bf16.msra.mxu1 %v3711_v26  ;;  %1224 = vmatprep.subr.bf16.mxu0 %v3716_v27  ;;  %v3753_v54 = vld [vmem:[%s4470_s28 + $0x190] ss:$8 sps:$4 sm:$0xff]   ;;  %v3761_v56 = vld [vmem:[%s4470_s28 + $0x1a4] ss:$8 sps:$4 sm:$0xff]   ;;  %v3759_v58 = vld [vmem:[%s4470_s28 + $0x1a0] ss:$8 sps:$4 sm:$0xff]  }
  0x80   : > { %1425 = vmatprep.subr.bf16.mxu1 %v3719_v28  ;;  %v3764_v59 = vld [vmem:[%s4470_s28 + $0xb4] ss:$8 sps:$4 sm:$0xff]   ;;  %v3762_v61 = vld [vmem:[%s4470_s28 + $0xb0] ss:$8 sps:$4 sm:$0xff]   ;;  %v3770_v63 = vld [vmem:[%s4470_s28 + $0xc4] ss:$8 sps:$4 sm:$0xff]  }
  0x81   : > { %v3767_v60 = vld [vmem:[%s4470_s28 + $0x1b4] ss:$8 sps:$4 sm:$0xff]   ;;  %v3765_v62 = vld [vmem:[%s4470_s28 + $0x1b0] ss:$8 sps:$4 sm:$0xff]   ;;  %v3773_v0 = vld [vmem:[%s4470_s28 + $0x1c4] ss:$8 sps:$4 sm:$0xff]  }
  0x82   : > { %1225 = vmatpush1.bf16.msra.mxu0 %v3714_v29  ;;  %v3768_v1 = vld [vmem:[%s4470_s28 + $0xc0] ss:$8 sps:$4 sm:$0xff]   ;;  %v3776_v3 = vld [vmem:[%s4470_s28 + $0xd4] ss:$8 sps:$4 sm:$0xff]   ;;  %v3774_v4 = vld [vmem:[%s4470_s28 + $0xd0] ss:$8 sps:$4 sm:$0xff]  }
  0x83   : > { %1426 = vmatpush1.bf16.msra.mxu1 %v3717_v30  ;;  %1226 = vmatprep.subr.bf16.mxu0 %v3722_v31  ;;  %v3771_v2 = vld [vmem:[%s4470_s28 + $0x1c0] ss:$8 sps:$4 sm:$0xff]   ;;  %v3779_v5 = vld [vmem:[%s4470_s28 + $0x1d4] ss:$8 sps:$4 sm:$0xff]   ;;  %v3777_v6 = vld [vmem:[%s4470_s28 + $0x1d0] ss:$8 sps:$4 sm:$0xff]  }
  0x84   : > { %1427 = vmatprep.subr.bf16.mxu1 %v3725_v32  ;;  %v3782_v7 = vld [vmem:[%s4470_s28 + $0xe4] ss:$8 sps:$4 sm:$0xff]   ;;  %v3780_v8 = vld [vmem:[%s4470_s28 + $0xe0] ss:$8 sps:$4 sm:$0xff]   ;;  %v3788_v11 = vld [vmem:[%s4470_s28 + $0xf4] ss:$8 sps:$4 sm:$0xff]  }
  0x85   : > { %v3785_v9 = vld [vmem:[%s4470_s28 + $0x1e4] ss:$8 sps:$4 sm:$0xff]   ;;  %v3783_v10 = vld [vmem:[%s4470_s28 + $0x1e0] ss:$8 sps:$4 sm:$0xff]   ;;  %v3786_v12 = vld [vmem:[%s4470_s28 + $0xf0] ss:$8 sps:$4 sm:$0xff]  }
  0x86   : > { %1227 = vmatpush1.bf16.msra.mxu0 %v3720_v33  ;;  %v3789_v13 = vld [vmem:[%s4470_s28 + $0x1f0] ss:$8 sps:$4 sm:$0xff]   ;;  %v3791_v14 = vld [vmem:[%s4470_s28 + $0x1f4] ss:$8 sps:$4 sm:$0xff]   ;;  %v3794_v15 = vld [vmem:[%s4470_s28 + $0x204] ss:$8 sps:$4 sm:$0xff]  }
  0x87   : > { %1428 = vmatpush1.bf16.msra.mxu1 %v3723_v34  ;;  %1228 = vmatprep.subr.bf16.mxu0 %v3728_v35  ;;  %v3797_v16 = vld [vmem:[%s4470_s28 + $0x304] ss:$8 sps:$4 sm:$0xff]   ;;  %v4251_v17 = vmov 1966171168   ;;  %v513_v21 = vshrl.u32 %v512_v19, 7  ;;  %vm2701_vm8 = vcmask 1047559  }
  0x88   : > { %1429 = vmatprep.subr.bf16.mxu1 %v3731_v36  ;;  %v510_v18 = vunpack.c.l.s4 %v4251_v17  ;;  %s4986_s12 = scalar_lea.sflag [#allocation4], %s310_s8  ;;  %s4110_s30 = scalar_lea.vmem %s4978_s13, 2048 }
  0x89   : > { %v4581_v33 = vsub.s32 0, %v513_v21  ;;  %v4583_v34 = vsub.s32 1, %v513_v21  ;;  %p4111_p9 = scmp.ne.s32.totalorder %s4978_s13, %s4110_s30  ;;  %p5078_p11 = scmp.ne.s32.totalorder %s5071_s27, 0 }
  0x8a   : > { %1229 = vmatpush1.bf16.msra.mxu0 %v3726_v37  ;;  %v511_v20 = vunpack.c.0.s8 %v510_v18  ;;  %s4252_s18 = smov [#allocation7]  }
  0x8b   : > { %1430 = vmatpush1.bf16.msra.mxu1 %v3729_v38  ;;  %1230 = vmatprep.subr.bf16.mxu0 %v3734_v39  ;;  %p4112_p0 = pnand %p4111_p9, %p5078_p11  ;;  %s4114_s10 = sshll.u32 %s4252_s18, 4  ;;  %s4115_s10 = int_to_ptr.vmem [resolvable:$false] %s4114_s10 }
  0x8c   : > { %1431 = vmatprep.subr.bf16.mxu1 %v3737_v40  ;;  %v514_v23 = vsub.s32 %v511_v20, %v513_v21  ;;  %v3803_v20 = vld [vmem:[%s4470_s28 + $0x314] ss:$8 sps:$4 sm:$0xff]   ;;  %s4116_s5 = scalar_lea.vmem %s4115_s10, 4096  ;;  %p4117_p10 = scmp.lt.s32.totalorder %s4978_s13, %s4115_s10 }
  0x8d   : > { %p4113_p8 = pneg %p4112_p0  ;;  %p4118_p13 = scmp.lt.s32.totalorder %s4116_s5, %s4110_s30 }
  0x8e   : > { %1231 = vmatpush1.bf16.msra.mxu0 %v3732_v41 }
  0x8f   : > { %1432 = vmatpush1.bf16.msra.mxu1 %v3735_v42  ;;  %1232 = vmatprep.subr.bf16.mxu0 %v3740_v43  ;;  %p4119_p5 = por %p4118_p13, %p4117_p10 }
  0x90   : > { %1433 = vmatprep.subr.bf16.mxu1 %v3743_v44 }
  0x91   : > { %p4120_p1 = pnand %p4119_p5, %p4113_p8 }
  0x92   : > { %1233 = vmatpush1.bf16.msra.mxu0 %v3738_v45 }
  0x93   : > { %1434 = vmatpush1.bf16.msra.mxu1 %v3741_v46  ;;  %1234 = vmatprep.subr.bf16.mxu0 %v3746_v47 }
  0x94   : > { %1435 = vmatprep.subr.bf16.mxu1 %v3749_v48 }
  0x96   : > { %1235 = vmatpush1.bf16.msra.mxu0 %v3744_v49 }
  0x97   : > { %1436 = vmatpush1.bf16.msra.mxu1 %v3747_v50  ;;  %1236 = vmatprep.subr.bf16.mxu0 %v3752_v51 }
  0x98   : > { %1437 = vmatprep.subr.bf16.mxu1 %v3755_v52 }
  0x9a   : > { %1237 = vmatpush1.bf16.msra.mxu0 %v3750_v53 }
  0x9b   : > { %1438 = vmatpush1.bf16.msra.mxu1 %v3753_v54  ;;  %1238 = vmatprep.subr.bf16.mxu0 %v3758_v55 }
  0x9c   : > { %1439 = vmatprep.subr.bf16.mxu1 %v3761_v56 }
  0x9e   : > { %1239 = vmatpush1.bf16.msra.mxu0 %v3756_v57 }
  0x9f   : > { %1440 = vmatpush1.bf16.msra.mxu1 %v3759_v58  ;;  %1240 = vmatprep.subr.bf16.mxu0 %v3764_v59 }
  0xa0   : > { %1441 = vmatprep.subr.bf16.mxu1 %v3767_v60 }
  0xa2   : > { %1241 = vmatpush1.bf16.msra.mxu0 %v3762_v61 }
  0xa3   : > { %1442 = vmatpush1.bf16.msra.mxu1 %v3765_v62  ;;  %1242 = vmatprep.subr.bf16.mxu0 %v3770_v63 }
  0xa4   : > { %1443 = vmatprep.subr.bf16.mxu1 %v3773_v0 }
  0xa6   : > { %1243 = vmatpush1.bf16.msra.mxu0 %v3768_v1 }
  0xa7   : > { %1444 = vmatpush1.bf16.msra.mxu1 %v3771_v2  ;;  %1244 = vmatprep.subr.bf16.mxu0 %v3776_v3 }
  0xa8   : > { %1445 = vmatprep.subr.bf16.mxu1 %v3779_v5 }
  0xaa   : > { %1245 = vmatpush1.bf16.msra.mxu0 %v3774_v4 }
  0xab   : > { %1446 = vmatpush1.bf16.msra.mxu1 %v3777_v6  ;;  %1246 = vmatprep.subr.bf16.mxu0 %v3782_v7  ;;  %v3792_v6 = vld [vmem:[%s4470_s28 + $0x200] ss:$8 sps:$4 sm:$0xff]  }
  0xac   : > { %1447 = vmatprep.subr.bf16.mxu1 %v3785_v9 }
  0xae   : > { %1247 = vmatpush1.bf16.msra.mxu0 %v3780_v8 }
  0xaf   : > { %1448 = vmatpush1.bf16.msra.mxu1 %v3783_v10  ;;  %1248 = vmatprep.subr.bf16.mxu0 %v3788_v11 }
  0xb0   : > { %1449 = vmatprep.subr.bf16.mxu1 %v3791_v14 }
  0xb2   : > { %1249 = vmatpush1.bf16.msra.mxu0 %v3786_v12  ;;  %v3800_v12 = vld [vmem:[%s4470_s28 + $0x214] ss:$8 sps:$4 sm:$0xff]  }
  0xb3   : > { %1450 = vmatpush1.bf16.msra.mxu1 %v3789_v13  ;;  %1620 = vmatprep.subr.bf16.mxu0 %v3794_v15  ;;  %v3795_v15 = vld [vmem:[%s4470_s28 + $0x300] ss:$8 sps:$4 sm:$0xff]  }
  0xb4   : > { %1821 = vmatprep.subr.bf16.mxu1 %v3797_v16 }
 0x148   : > { %v424_v22 = vpop.f32.mrb[0].mxu0 }
 0x149   : > { %v500_v24 = vpop.f32.mrb[0].mxu1  ;;  %v426_v25 = vpop.f32.mrb[1].mxu0 }
 0x14a   : > { %v507_v26 = vcombine.low %v424_v22, %v426_v25  ;;  %v508_v27 = vcombine.high %v424_v22, %v426_v25  ;;  %v502_v28 = vpop.f32.mrb[1].mxu1 }
 0x14b   : > { %v559_v29 = vcombine.low %v500_v24, %v502_v28  ;;  %v560_v30 = vcombine.high %v500_v24, %v502_v28  ;;  %v3798_v24 = vld [vmem:[%s4470_s28 + $0x210] ss:$8 sps:$4 sm:$0xff]  }
 0x14c   : > { %v515_v31 = vrot.slane %v507_v26, %v514_v23  ;;  %v522_v32 = vrot.slane %v508_v27, %v514_v23 }
 0x14d   : > { %v567_v35 = vrot.slane %v559_v29, %v514_v23  ;;  %v574_v36 = vrot.slane %v560_v30, %v514_v23  ;;  %v3806_v29 = vld [vmem:[%s4470_s28 + $0x224] ss:$8 sps:$4 sm:$0xff]  }
 0x14e   : > { %v523_v37 = vcombine.high %v515_v31, %v515_v31  ;;  %v524_v38 = vcombine.high %v522_v32, %v522_v32  ;;  %v531_v39 = vrot.slane %v515_v31, %v514_v23  ;;  %v4585_v40 = vrot.slane %v522_v32, %v514_v23  ;;  %v3801_v32 = vld [vmem:[%s4470_s28 + $0x310] ss:$8 sps:$4 sm:$0xff]  }
 0x14f   : > { %v575_v41 = vcombine.high %v567_v35, %v567_v35  ;;  %v576_v42 = vcombine.high %v574_v36, %v574_v36  ;;  %v583_v43 = vrot.slane %v567_v35, %v514_v23  ;;  %v4587_v44 = vrot.slane %v574_v36, %v514_v23 }
 0x150   : > { %v545_v45 = vrot.slane %v523_v37, %v514_v23  ;;  %v4589_v46 = vrot.slane %v524_v38, %v514_v23  ;;  %v553_v47 = vcombine.high %v531_v39, %v531_v39  ;;  %v4593_v48 = vcombine.high %v4585_v40, %v4585_v40  ;;  %v3809_v37 = vld [vmem:[%s4470_s28 + $0x324] ss:$8 sps:$4 sm:$0xff]  }
 0x151   : > { %v612_v49 = vrot.slane %v531_v39, %v4581_v33  ;;  %v644_v50 = vrot.slane %v4585_v40, %v4581_v33  ;;  %v597_v51 = vrot.slane %v575_v41, %v514_v23  ;;  %v4598_v52 = vrot.slane %v576_v42, %v514_v23  ;;  %v3804_v41 = vld [vmem:[%s4470_s28 + $0x220] ss:$8 sps:$4 sm:$0xff]  }
 0x152   : > { %v605_v53 = vcombine.high %v583_v43, %v583_v43  ;;  %v4602_v54 = vcombine.high %v4587_v44, %v4587_v44  ;;  %v692_v55 = vrot.slane %v583_v43, %v4581_v33  ;;  %v724_v56 = vrot.slane %v4587_v44, %v4581_v33 }
 0x153   : > { %v616_v57 = vrot.slane %v531_v39, %v4583_v34  ;;  %v696_v58 = vrot.slane %v583_v43, %v4583_v34  ;;  %v624_v59 = vrot.slane %v545_v45, %v4583_v34  ;;  %v704_v60 = vrot.slane %v597_v51, %v4583_v34 }
 0x154   : > { %v770_v61 = vsel %vm769_vm1, %v612_v49, %v692_v55  ;;  %v632_v62 = vrot.slane %v553_v47, %v4583_v34  ;;  %v712_v63 = vrot.slane %v605_v53, %v4583_v34  ;;  %v620_v0 = vrot.slane %v545_v45, %v4581_v33 }
 0x155   : > { %v771_v1 = vsel %vm769_vm1, %v616_v57, %v696_v58  ;;  %v786_v2 = vpack.c.bf16 %v770_v61, %v770_v61  ;;  %v773_v3 = vsel %vm769_vm1, %v624_v59, %v704_v60  ;;  %v700_v4 = vrot.slane %v597_v51, %v4581_v33  ;;  %v3818_v60 = vld [vmem:[%s4470_s28 + $0x244] ss:$8 sps:$4 sm:$0xff]   ;;  %v3813_v61 = vld [vmem:[%s4470_s28 + $0x330] ss:$8 sps:$4 sm:$0xff]  }
 0x156   : > { %v787_v5 = vpack.c.bf16 %v771_v1, %v771_v1  ;;  %v789_v7 = vpack.c.bf16 %v773_v3, %v773_v3  ;;  %v775_v8 = vsel %vm769_vm1, %v632_v62, %v712_v63  ;;  %v555_v9 = vcombine.high %v545_v45, %v545_v45  ;;  %v3819_v1 = vld [vmem:[%s4470_s28 + $0x340] ss:$8 sps:$4 sm:$0xff]   ;;  %v3822_v3 = vld [vmem:[%s4470_s28 + $0x250] ss:$8 sps:$4 sm:$0xff]  }
 0x157   : > { %v791_v10 = vpack.c.bf16 %v775_v8, %v775_v8  ;;  %v772_v11 = vsel %vm769_vm1, %v620_v0, %v700_v4  ;;  %v607_v13 = vcombine.high %v597_v51, %v597_v51  ;;  %v628_v14 = vrot.slane %v553_v47, %v4581_v33  ;;  %v3816_v0 = vld [vmem:[%s4470_s28 + $0x240] ss:$8 sps:$4 sm:$0xff]   ;;  %v3830_v4 = vld [vmem:[%s4470_s28 + $0x264] ss:$8 sps:$4 sm:$0xff]   ;;  %v3836_v8 = vld [vmem:[%s4470_s28 + $0x274] ss:$8 sps:$4 sm:$0xff]  }
 0x158   : > { %1250 = vmatprep.mubr.bf16.mxu0 %v787_v5  ;;  %1451 = vmatprep.mubr.bf16.mxu1 %v789_v7  ;;  %v788_v16 = vpack.c.bf16 %v772_v11, %v772_v11  ;;  %v640_v17 = vrot.slane %v555_v9, %v4583_v34  ;;  %v708_v18 = vrot.slane %v605_v53, %v4581_v33  ;;  %v3825_v5 = vld [vmem:[%s4470_s28 + $0x350] ss:$8 sps:$4 sm:$0xff]   ;;  %v3828_v7 = vld [vmem:[%s4470_s28 + $0x260] ss:$8 sps:$4 sm:$0xff]  }
 0x159   : > { %1251 = vmatmul.mubr.bf16.vlgmr.msra.gmra.mrb[4].mxu0 %v786_v2  ;;  %v720_v19 = vrot.slane %v607_v13, %v4583_v34  ;;  %v648_v21 = vrot.slane %v4585_v40, %v4583_v34  ;;  %v728_v22 = vrot.slane %v4587_v44, %v4583_v34  ;;  %v636_v23 = vrot.slane %v555_v9, %v4581_v33  ;;  %v3812_v44 = vld [vmem:[%s4470_s28 + $0x234] ss:$8 sps:$4 sm:$0xff]   ;;  %v3831_v9 = vld [vmem:[%s4470_s28 + $0x360] ss:$8 sps:$4 sm:$0xff]   ;;  %v3834_v11 = vld [vmem:[%s4470_s28 + $0x270] ss:$8 sps:$4 sm:$0xff]  }
 0x15a   : > { %1621 = vmatpush1.bf16.msra.mxu0 %v3792_v6  ;;  %1652 = vmatprep.mubr.bf16.mxu0 %v791_v10  ;;  %v4635_v25 = vsel %vm769_vm1, %v628_v14, %v708_v18  ;;  %v716_v26 = vrot.slane %v607_v13, %v4581_v33  ;;  %v656_v27 = vrot.slane %v4589_v46, %v4583_v34  ;;  %v3827_v2 = vld [vmem:[%s4470_s28 + $0x354] ss:$8 sps:$4 sm:$0xff]   ;;  %v3833_v6 = vld [vmem:[%s4470_s28 + $0x364] ss:$8 sps:$4 sm:$0xff]   ;;  %v3837_v13 = vld [vmem:[%s4470_s28 + $0x370] ss:$8 sps:$4 sm:$0xff]  }
 0x15b   : > { %1452 = vmatmul.mubr.bf16.vlgmr.msra.gmra.mrb[4].mxu1 %v788_v16  ;;  %1622 = vmatprep.subr.bf16.mxu0 %v3800_v12  ;;  %v777_v28 = vsel %vm769_vm1, %v640_v17, %v720_v19  ;;  %v4643_v30 = vsel %vm769_vm1, %v648_v21, %v728_v22  ;;  %v736_v36 = vrot.slane %v4598_v52, %v4583_v34  ;;  %v3839_v10 = vld [vmem:[%s4470_s28 + $0x374] ss:$8 sps:$4 sm:$0xff]   ;;  %v3842_v12 = vld [vmem:[%s4470_s28 + $0x284] ss:$8 sps:$4 sm:$0xff]   ;;  %v3843_v17 = vld [vmem:[%s4470_s28 + $0x380] ss:$8 sps:$4 sm:$0xff]  }
 0x15c   : > { %1822 = vmatpush1.bf16.msra.mxu1 %v3795_v15  ;;  %v793_v31 = vpack.c.bf16 %v777_v28, %v777_v28  ;;  %v4647_v35 = vsel %vm769_vm1, %v636_v23, %v716_v26  ;;  %v4653_v38 = vsel %vm769_vm1, %v644_v50, %v724_v56  ;;  %v664_v39 = vrot.slane %v4593_v48, %v4583_v34  ;;  %v3807_v50 = vld [vmem:[%s4470_s28 + $0x320] ss:$8 sps:$4 sm:$0xff]   ;;  %v3815_v56 = vld [vmem:[%s4470_s28 + $0x334] ss:$8 sps:$4 sm:$0xff]   ;;  %v3845_v14 = vld [vmem:[%s4470_s28 + $0x384] ss:$8 sps:$4 sm:$0xff]  }
 0x15d   : > { %1823 = vmatprep.subr.bf16.mxu1 %v3803_v20  ;;  %v744_v40 = vrot.slane %v4602_v54, %v4583_v34  ;;  %v4661_v42 = vsel %vm769_vm1, %v656_v27, %v736_v36  ;;  %v652_v43 = vrot.slane %v4589_v46, %v4581_v33  ;;  %v732_v47 = vrot.slane %v4598_v52, %v4581_v33  ;;  %v3840_v15 = vld [vmem:[%s4470_s28 + $0x280] ss:$8 sps:$4 sm:$0xff]   ;;  %v3848_v16 = vld [vmem:[%s4470_s28 + $0x294] ss:$8 sps:$4 sm:$0xff]   ;;  %v3846_v19 = vld [vmem:[%s4470_s28 + $0x290] ss:$8 sps:$4 sm:$0xff]  }
 0x15e   : > { %1853 = vmatprep.mubr.bf16.mxu1 %v793_v31  ;;  %1623 = vmatpush1.bf16.msra.mxu0 %v3798_v24  ;;  %v556_v49 = vcombine.high %v4589_v46, %v4589_v46  ;;  %v608_v51 = vcombine.high %v4598_v52, %v4598_v52  ;;  %v660_v53 = vrot.slane %v4593_v48, %v4581_v33  ;;  %v3810_v52 = vld [vmem:[%s4470_s28 + $0x230] ss:$8 sps:$4 sm:$0xff]   ;;  %v3851_v18 = vld [vmem:[%s4470_s28 + $0x394] ss:$8 sps:$4 sm:$0xff]   ;;  %v3854_v20 = vld [vmem:[%s4470_s28 + $0x2a4] ss:$8 sps:$4 sm:$0xff]  }
 0x15f   : > { %1624 = vmatprep.subr.bf16.mxu0 %v3806_v29  ;;  %v4667_v45 = vsel %vm769_vm1, %v664_v39, %v744_v40  ;;  %v740_v55 = vrot.slane %v4602_v54, %v4581_v33  ;;  %v4682_v57 = vsel %vm769_vm1, %v652_v43, %v732_v47  ;;  %v3849_v21 = vld [vmem:[%s4470_s28 + $0x390] ss:$8 sps:$4 sm:$0xff]   ;;  %v3857_v22 = vld [vmem:[%s4470_s28 + $0x3a4] ss:$8 sps:$4 sm:$0xff]   ;;  %v3852_v23 = vld [vmem:[%s4470_s28 + $0x2a0] ss:$8 sps:$4 sm:$0xff]  }
 0x160   : > { %1824 = vmatpush1.bf16.msra.mxu1 %v3801_v32  ;;  %v672_v46 = vrot.slane %v556_v49, %v4583_v34  ;;  %v668_v58 = vrot.slane %v556_v49, %v4581_v33  ;;  %v752_v59 = vrot.slane %v608_v51, %v4583_v34  ;;  %v748_v54 = vrot.slane %v608_v51, %v4581_v33  ;;  %v3821_v34 = vld [vmem:[%s4470_s28 + $0x344] ss:$8 sps:$4 sm:$0xff]   ;;  %v3824_v33 = vld [vmem:[%s4470_s28 + $0x254] ss:$8 sps:$4 sm:$0xff]   ;;  %v3855_v26 = vld [vmem:[%s4470_s28 + $0x3a0] ss:$8 sps:$4 sm:$0xff]  }
 0x161   : > { %1825 = vmatprep.subr.bf16.mxu1 %v3809_v37  ;;  %v4689_v48 = vsel %vm769_vm1, %v660_v53, %v740_v55  ;;  %v3860_v24 = vld [vmem:[%s4470_s28 + $0x2b4] ss:$8 sps:$4 sm:$0xff]   ;;  %v3858_v28 = vld [vmem:[%s4470_s28 + $0x2b0] ss:$8 sps:$4 sm:$0xff]   ;;  %v3866_v29 = vld [vmem:[%s4470_s28 + $0x2c4] ss:$8 sps:$4 sm:$0xff]  }
 0x162   : > { %1625 = vmatpush1.bf16.msra.mxu0 %v3804_v41  ;;  %v4695_v62 = vsel %vm769_vm1, %v672_v46, %v752_v59  ;;  %v4698_v63 = vsel %vm769_vm1, %v668_v58, %v748_v54  ;;  %v3863_v27 = vld [vmem:[%s4470_s28 + $0x3b4] ss:$8 sps:$4 sm:$0xff]   ;;  %v3861_v31 = vld [vmem:[%s4470_s28 + $0x3b0] ss:$8 sps:$4 sm:$0xff]   ;;  %v3869_v32 = vld [vmem:[%s4470_s28 + $0x3c4] ss:$8 sps:$4 sm:$0xff]   ;;  %v790_v59 = vpack.c.bf16 %v4635_v25, %v4635_v25  ;;  %v797_v25 = vpack.c.bf16 %v4661_v42, %v4661_v42 }
 0x163   : > { %1626 = vmatprep.subr.bf16.mxu0 %v3812_v44  ;;  %v3864_v36 = vld [vmem:[%s4470_s28 + $0x2c0] ss:$8 sps:$4 sm:$0xff]   ;;  %v3872_v37 = vld [vmem:[%s4470_s28 + $0x2d4] ss:$8 sps:$4 sm:$0xff]   ;;  %v3870_v41 = vld [vmem:[%s4470_s28 + $0x2d0] ss:$8 sps:$4 sm:$0xff]  }
 0x164   : > { %1826 = vmatpush1.bf16.msra.mxu1 %v3807_v50  ;;  %v3867_v39 = vld [vmem:[%s4470_s28 + $0x3c0] ss:$8 sps:$4 sm:$0xff]   ;;  %v3875_v40 = vld [vmem:[%s4470_s28 + $0x3d4] ss:$8 sps:$4 sm:$0xff]   ;;  %v3878_v43 = vld [vmem:[%s4470_s28 + $0x2e4] ss:$8 sps:$4 sm:$0xff]  }
 0x165   : > { %1827 = vmatprep.subr.bf16.mxu1 %v3815_v56  ;;  %v3873_v44 = vld [vmem:[%s4470_s28 + $0x3d0] ss:$8 sps:$4 sm:$0xff]   ;;  %v3881_v47 = vld [vmem:[%s4470_s28 + $0x3e4] ss:$8 sps:$4 sm:$0xff]   ;;  %v3876_v49 = vld [vmem:[%s4470_s28 + $0x2e0] ss:$8 sps:$4 sm:$0xff]  }
 0x166   : > { %1627 = vmatpush1.bf16.msra.mxu0 %v3810_v52  ;;  %v3884_v50 = vld [vmem:[%s4470_s28 + $0x2f4] ss:$8 sps:$4 sm:$0xff]   ;;  %v3879_v51 = vld [vmem:[%s4470_s28 + $0x3e0] ss:$8 sps:$4 sm:$0xff]   ;;  %v3882_v55 = vld [vmem:[%s4470_s28 + $0x2f0] ss:$8 sps:$4 sm:$0xff]  }
 0x167   : > { %1628 = vmatprep.subr.bf16.mxu0 %v3818_v60  ;;  %v3887_v53 = vld [vmem:[%s4470_s28 + $0x3f4] ss:$8 sps:$4 sm:$0xff]   ;;  %v3890_v56 = vld [vmem:[%s4470_s28 + $0x404] ss:$8 sps:$4 sm:$0xff]   ;;  %v3885_v46 = vld [vmem:[%s4470_s28 + $0x3f0] ss:$8 sps:$4 sm:$0xff]   ;;  %v795_v60 = vpack.c.bf16 %v4643_v30, %v4643_v30 }
 0x168   : > { %1828 = vmatpush1.bf16.msra.mxu1 %v3813_v61  ;;  %v3893_v58 = vld [vmem:[%s4470_s28 + $0x504] ss:$8 sps:$4 sm:$0xff]   ;;  %v3888_v52 = vld [vmem:[%s4470_s28 + $0x400] ss:$8 sps:$4 sm:$0xff]   ;;  %v3896_v54 = vld [vmem:[%s4470_s28 + $0x414] ss:$8 sps:$4 sm:$0xff]  }
 0x169   : > { %1829 = vmatprep.subr.bf16.mxu1 %v3821_v34  ;;  %v3891_v61 = vld [vmem:[%s4470_s28 + $0x500] ss:$8 sps:$4 sm:$0xff]   ;;  %v792_v34 = vpack.c.bf16 %v4647_v35, %v4647_v35  ;;  %v3902_v30 = vld [vmem:[%s4470_s28 + $0x424] ss:$8 sps:$4 sm:$0xff]   ;;  %v3897_v35 = vld [vmem:[%s4470_s28 + $0x510] ss:$8 sps:$4 sm:$0xff]  }
 0x16a   : > { %1629 = vmatpush1.bf16.msra.mxu0 %v3816_v0  ;;  %v3899_v0 = vld [vmem:[%s4470_s28 + $0x514] ss:$8 sps:$4 sm:$0xff]   ;;  %v3903_v42 = vld [vmem:[%s4470_s28 + $0x520] ss:$8 sps:$4 sm:$0xff]  }
 0x16b   : > { %1630 = vmatprep.subr.bf16.mxu0 %v3824_v33  ;;  %v3894_v33 = vld [vmem:[%s4470_s28 + $0x410] ss:$8 sps:$4 sm:$0xff]  }
 0x16c   : > { %1830 = vmatpush1.bf16.msra.mxu1 %v3819_v1  ;;  %v3905_v1 = vld [vmem:[%s4470_s28 + $0x524] ss:$8 sps:$4 sm:$0xff]  }
 0x16d   : > { %1831 = vmatprep.subr.bf16.mxu1 %v3827_v2  ;;  %v3900_v2 = vld [vmem:[%s4470_s28 + $0x420] ss:$8 sps:$4 sm:$0xff]  }
 0x16e   : > { %1631 = vmatpush1.bf16.msra.mxu0 %v3822_v3  ;;  %v3908_v3 = vld [vmem:[%s4470_s28 + $0x434] ss:$8 sps:$4 sm:$0xff]  }
 0x16f   : > { %1632 = vmatprep.subr.bf16.mxu0 %v3830_v4  ;;  %v3911_v4 = vld [vmem:[%s4470_s28 + $0x534] ss:$8 sps:$4 sm:$0xff]  }
 0x170   : > { %1832 = vmatpush1.bf16.msra.mxu1 %v3825_v5  ;;  %v3906_v5 = vld [vmem:[%s4470_s28 + $0x430] ss:$8 sps:$4 sm:$0xff]  }
 0x171   : > { %1833 = vmatprep.subr.bf16.mxu1 %v3833_v6  ;;  %v3914_v6 = vld [vmem:[%s4470_s28 + $0x444] ss:$8 sps:$4 sm:$0xff]  }
 0x172   : > { %1633 = vmatpush1.bf16.msra.mxu0 %v3828_v7  ;;  %v3909_v7 = vld [vmem:[%s4470_s28 + $0x530] ss:$8 sps:$4 sm:$0xff]  }
 0x173   : > { %1634 = vmatprep.subr.bf16.mxu0 %v3836_v8  ;;  %v3917_v8 = vld [vmem:[%s4470_s28 + $0x544] ss:$8 sps:$4 sm:$0xff]  }
 0x174   : > { %1834 = vmatpush1.bf16.msra.mxu1 %v3831_v9  ;;  %v3912_v9 = vld [vmem:[%s4470_s28 + $0x440] ss:$8 sps:$4 sm:$0xff]  }
 0x175   : > { %1835 = vmatprep.subr.bf16.mxu1 %v3839_v10  ;;  %v3920_v10 = vld [vmem:[%s4470_s28 + $0x454] ss:$8 sps:$4 sm:$0xff]  }
 0x176   : > { %1635 = vmatpush1.bf16.msra.mxu0 %v3834_v11  ;;  %v3915_v11 = vld [vmem:[%s4470_s28 + $0x540] ss:$8 sps:$4 sm:$0xff]  }
 0x177   : > { %1636 = vmatprep.subr.bf16.mxu0 %v3842_v12  ;;  %v3923_v12 = vld [vmem:[%s4470_s28 + $0x554] ss:$8 sps:$4 sm:$0xff]  }
 0x178   : > { %1836 = vmatpush1.bf16.msra.mxu1 %v3837_v13  ;;  %v3918_v13 = vld [vmem:[%s4470_s28 + $0x450] ss:$8 sps:$4 sm:$0xff]  }
 0x179   : > { %1837 = vmatprep.subr.bf16.mxu1 %v3845_v14  ;;  %v3926_v14 = vld [vmem:[%s4470_s28 + $0x464] ss:$8 sps:$4 sm:$0xff]  }
 0x17a   : > { %1637 = vmatpush1.bf16.msra.mxu0 %v3840_v15  ;;  %v3921_v15 = vld [vmem:[%s4470_s28 + $0x550] ss:$8 sps:$4 sm:$0xff]  }
 0x17b   : > { %1638 = vmatprep.subr.bf16.mxu0 %v3848_v16  ;;  %v3929_v16 = vld [vmem:[%s4470_s28 + $0x564] ss:$8 sps:$4 sm:$0xff]  }
 0x17c   : > { %1838 = vmatpush1.bf16.msra.mxu1 %v3843_v17  ;;  %v3924_v17 = vld [vmem:[%s4470_s28 + $0x460] ss:$8 sps:$4 sm:$0xff]  }
 0x17d   : > { %1839 = vmatprep.subr.bf16.mxu1 %v3851_v18  ;;  %v3932_v18 = vld [vmem:[%s4470_s28 + $0x474] ss:$8 sps:$4 sm:$0xff]  }
 0x17e   : > { %1639 = vmatpush1.bf16.msra.mxu0 %v3846_v19  ;;  %v3927_v19 = vld [vmem:[%s4470_s28 + $0x560] ss:$8 sps:$4 sm:$0xff]  }
 0x17f   : > { %1640 = vmatprep.subr.bf16.mxu0 %v3854_v20  ;;  %v3935_v20 = vld [vmem:[%s4470_s28 + $0x574] ss:$8 sps:$4 sm:$0xff]  }
 0x180   : > { %1840 = vmatpush1.bf16.msra.mxu1 %v3849_v21  ;;  %v3930_v21 = vld [vmem:[%s4470_s28 + $0x470] ss:$8 sps:$4 sm:$0xff]  }
 0x181   : > { %1841 = vmatprep.subr.bf16.mxu1 %v3857_v22  ;;  %v3938_v22 = vld [vmem:[%s4470_s28 + $0x484] ss:$8 sps:$4 sm:$0xff]  }
 0x182   : > { %1641 = vmatpush1.bf16.msra.mxu0 %v3852_v23  ;;  %v3933_v23 = vld [vmem:[%s4470_s28 + $0x570] ss:$8 sps:$4 sm:$0xff]  }
 0x183   : > { %1642 = vmatprep.subr.bf16.mxu0 %v3860_v24  ;;  %v3941_v24 = vld [vmem:[%s4470_s28 + $0x584] ss:$8 sps:$4 sm:$0xff]  }
 0x184   : > { %1842 = vmatpush1.bf16.msra.mxu1 %v3855_v26  ;;  %v3936_v26 = vld [vmem:[%s4470_s28 + $0x480] ss:$8 sps:$4 sm:$0xff]  }
 0x185   : > { %1843 = vmatprep.subr.bf16.mxu1 %v3863_v27  ;;  %v3944_v27 = vld [vmem:[%s4470_s28 + $0x494] ss:$8 sps:$4 sm:$0xff]  }
 0x186   : > { %1643 = vmatpush1.bf16.msra.mxu0 %v3858_v28  ;;  %v3939_v28 = vld [vmem:[%s4470_s28 + $0x580] ss:$8 sps:$4 sm:$0xff]  }
 0x187   : > { %1644 = vmatprep.subr.bf16.mxu0 %v3866_v29  ;;  %v3947_v29 = vld [vmem:[%s4470_s28 + $0x594] ss:$8 sps:$4 sm:$0xff]  }
 0x188   : > { %1844 = vmatpush1.bf16.msra.mxu1 %v3861_v31  ;;  %v3942_v31 = vld [vmem:[%s4470_s28 + $0x490] ss:$8 sps:$4 sm:$0xff]  }
 0x189   : > { %1845 = vmatprep.subr.bf16.mxu1 %v3869_v32  ;;  %v3950_v32 = vld [vmem:[%s4470_s28 + $0x4a4] ss:$8 sps:$4 sm:$0xff]  }
 0x18a   : > { %1645 = vmatpush1.bf16.msra.mxu0 %v3864_v36  ;;  %v3945_v36 = vld [vmem:[%s4470_s28 + $0x590] ss:$8 sps:$4 sm:$0xff]  }
 0x18b   : > { %1646 = vmatprep.subr.bf16.mxu0 %v3872_v37  ;;  %v3953_v37 = vld [vmem:[%s4470_s28 + $0x5a4] ss:$8 sps:$4 sm:$0xff]  }
 0x18c   : > { %1846 = vmatpush1.bf16.msra.mxu1 %v3867_v39  ;;  %v3948_v39 = vld [vmem:[%s4470_s28 + $0x4a0] ss:$8 sps:$4 sm:$0xff]  }
 0x18d   : > { %1847 = vmatprep.subr.bf16.mxu1 %v3875_v40  ;;  %v3956_v40 = vld [vmem:[%s4470_s28 + $0x4b4] ss:$8 sps:$4 sm:$0xff]  }
 0x18e   : > { %1647 = vmatpush1.bf16.msra.mxu0 %v3870_v41  ;;  %v3951_v41 = vld [vmem:[%s4470_s28 + $0x5a0] ss:$8 sps:$4 sm:$0xff]  }
 0x18f   : > { %1648 = vmatprep.subr.bf16.mxu0 %v3878_v43  ;;  %v3959_v43 = vld [vmem:[%s4470_s28 + $0x5b4] ss:$8 sps:$4 sm:$0xff]  }
 0x190   : > { %1848 = vmatpush1.bf16.msra.mxu1 %v3873_v44  ;;  %v3954_v44 = vld [vmem:[%s4470_s28 + $0x4b0] ss:$8 sps:$4 sm:$0xff]  }
 0x191   : > { %1849 = vmatprep.subr.bf16.mxu1 %v3881_v47  ;;  %v3962_v47 = vld [vmem:[%s4470_s28 + $0x4c4] ss:$8 sps:$4 sm:$0xff]  }
 0x192   : > { %1649 = vmatpush1.bf16.msra.mxu0 %v3876_v49  ;;  %v3957_v49 = vld [vmem:[%s4470_s28 + $0x5b0] ss:$8 sps:$4 sm:$0xff]  }
 0x193   : > { %1650 = vmatprep.subr.bf16.mxu0 %v3884_v50  ;;  %v3965_v50 = vld [vmem:[%s4470_s28 + $0x5c4] ss:$8 sps:$4 sm:$0xff]  }
 0x194   : > { %1850 = vmatpush1.bf16.msra.mxu1 %v3879_v51  ;;  %v3960_v51 = vld [vmem:[%s4470_s28 + $0x4c0] ss:$8 sps:$4 sm:$0xff]  }
 0x195   : > { %1851 = vmatprep.subr.bf16.mxu1 %v3887_v53  ;;  %v3968_v53 = vld [vmem:[%s4470_s28 + $0x4d4] ss:$8 sps:$4 sm:$0xff]  }
 0x196   : > { %1651 = vmatpush1.bf16.msra.mxu0 %v3882_v55  ;;  %v3963_v55 = vld [vmem:[%s4470_s28 + $0x5c0] ss:$8 sps:$4 sm:$0xff]  }
 0x197   : > { %2022 = vmatprep.subr.bf16.mxu0 %v3890_v56  ;;  %v3971_v56 = vld [vmem:[%s4470_s28 + $0x5d4] ss:$8 sps:$4 sm:$0xff]  }
 0x198   : > { %1852 = vmatpush1.bf16.msra.mxu1 %v3885_v46  ;;  %v3966_v46 = vld [vmem:[%s4470_s28 + $0x4d0] ss:$8 sps:$4 sm:$0xff]  }
 0x199   : > { %1653 = vmatmul.mubr.bf16.vlgmr.msra.gmra.mrb[8].mxu0 %v790_v59  ;;  %2223 = vmatprep.subr.bf16.mxu1 %v3893_v58  ;;  %v3974_v58 = vld [vmem:[%s4470_s28 + $0x4e4] ss:$8 sps:$4 sm:$0xff]  }
 0x19a   : > { %2023 = vmatpush1.bf16.msra.mxu0 %v3888_v52  ;;  %2054 = vmatprep.mubr.bf16.mxu0 %v795_v60  ;;  %v3969_v52 = vld [vmem:[%s4470_s28 + $0x5d0] ss:$8 sps:$4 sm:$0xff]   ;;  %v3977_v59 = vld [vmem:[%s4470_s28 + $0x5e4] ss:$8 sps:$4 sm:$0xff]   ;;  %v3980_v60 = vld [vmem:[%s4470_s28 + $0x4f4] ss:$8 sps:$4 sm:$0xff]  }
 0x19b   : > { %1854 = vmatmul.mubr.bf16.vlgmr.msra.gmra.mrb[8].mxu1 %v792_v34  ;;  %2024 = vmatprep.subr.bf16.mxu0 %v3896_v54  ;;  %v3972_v54 = vld [vmem:[%s4470_s28 + $0x4e0] ss:$8 sps:$4 sm:$0xff]   ;;  %v3983_v34 = vld [vmem:[%s4470_s28 + $0x5f4] ss:$8 sps:$4 sm:$0xff]  }
 0x19c   : > { %2224 = vmatpush1.bf16.msra.mxu1 %v3891_v61  ;;  %2255 = vmatprep.mubr.bf16.mxu1 %v797_v25  ;;  %v3975_v61 = vld [vmem:[%s4470_s28 + $0x5e0] ss:$8 sps:$4 sm:$0xff]   ;;  %v3986_v25 = vld [vmem:[%s4470_s28 + $0x604] ss:$8 sps:$4 sm:$0xff]  }
 0x19d   : > { %2225 = vmatprep.subr.bf16.mxu1 %v3899_v0  ;;  %v3978_v0 = vld [vmem:[%s4470_s28 + $0x4f0] ss:$8 sps:$4 sm:$0xff]  }
 0x19e   : > { %2025 = vmatpush1.bf16.msra.mxu0 %v3894_v33  ;;  %v3981_v33 = vld [vmem:[%s4470_s28 + $0x5f0] ss:$8 sps:$4 sm:$0xff]  }
 0x19f   : > { %2026 = vmatprep.subr.bf16.mxu0 %v3902_v30  ;;  %v3989_v30 = vld [vmem:[%s4470_s28 + $0x704] ss:$8 sps:$4 sm:$0xff]  }
 0x1a0   : > { %2226 = vmatpush1.bf16.msra.mxu1 %v3897_v35  ;;  %v3984_v35 = vld [vmem:[%s4470_s28 + $0x600] ss:$8 sps:$4 sm:$0xff]  }
 0x1a1   : > { %2227 = vmatprep.subr.bf16.mxu1 %v3905_v1  ;;  %v794_v1 = vpack.c.bf16 %v4653_v38, %v4653_v38  ;;  %v801_v38 = vpack.c.bf16 %v4695_v62, %v4695_v62  ;;  %v3999_v62 = vld [vmem:[%s4470_s28 + $0x720] ss:$8 sps:$4 sm:$0xff]  }
 0x1a2   : > { %2027 = vmatpush1.bf16.msra.mxu0 %v3900_v2  ;;  %v3992_v2 = vld [vmem:[%s4470_s28 + $0x614] ss:$8 sps:$4 sm:$0xff]  }
 0x1a3   : > { %2028 = vmatprep.subr.bf16.mxu0 %v3908_v3  ;;  %v799_v3 = vpack.c.bf16 %v4667_v45, %v4667_v45  ;;  %v3998_v45 = vld [vmem:[%s4470_s28 + $0x624] ss:$8 sps:$4 sm:$0xff]  }
 0x1a4   : > { %2228 = vmatpush1.bf16.msra.mxu1 %v3903_v42  ;;  %v3987_v42 = vld [vmem:[%s4470_s28 + $0x700] ss:$8 sps:$4 sm:$0xff]  }
 0x1a5   : > { %2229 = vmatprep.subr.bf16.mxu1 %v3911_v4  ;;  %v796_v4 = vpack.c.bf16 %v4682_v57, %v4682_v57  ;;  %v3993_v57 = vld [vmem:[%s4470_s28 + $0x710] ss:$8 sps:$4 sm:$0xff]  }
 0x1a6   : > { %2029 = vmatpush1.bf16.msra.mxu0 %v3906_v5  ;;  %v3995_v5 = vld [vmem:[%s4470_s28 + $0x714] ss:$8 sps:$4 sm:$0xff]  }
 0x1a7   : > { %2030 = vmatprep.subr.bf16.mxu0 %v3914_v6  ;;  %v3990_v6 = vld [vmem:[%s4470_s28 + $0x610] ss:$8 sps:$4 sm:$0xff]  }
 0x1a8   : > { %2230 = vmatpush1.bf16.msra.mxu1 %v3909_v7  ;;  %v4001_v7 = vld [vmem:[%s4470_s28 + $0x724] ss:$8 sps:$4 sm:$0xff]  }
 0x1a9   : > { %2231 = vmatprep.subr.bf16.mxu1 %v3917_v8  ;;  %v3996_v8 = vld [vmem:[%s4470_s28 + $0x620] ss:$8 sps:$4 sm:$0xff]  }
 0x1aa   : > { %2031 = vmatpush1.bf16.msra.mxu0 %v3912_v9  ;;  %v4004_v9 = vld [vmem:[%s4470_s28 + $0x634] ss:$8 sps:$4 sm:$0xff]  }
 0x1ab   : > { %2032 = vmatprep.subr.bf16.mxu0 %v3920_v10  ;;  %v4007_v10 = vld [vmem:[%s4470_s28 + $0x734] ss:$8 sps:$4 sm:$0xff]  }
 0x1ac   : > { %2232 = vmatpush1.bf16.msra.mxu1 %v3915_v11  ;;  %v4002_v11 = vld [vmem:[%s4470_s28 + $0x630] ss:$8 sps:$4 sm:$0xff]  }
 0x1ad   : > { %2233 = vmatprep.subr.bf16.mxu1 %v3923_v12  ;;  %v4010_v12 = vld [vmem:[%s4470_s28 + $0x644] ss:$8 sps:$4 sm:$0xff]  }
 0x1ae   : > { %2033 = vmatpush1.bf16.msra.mxu0 %v3918_v13  ;;  %v4005_v13 = vld [vmem:[%s4470_s28 + $0x730] ss:$8 sps:$4 sm:$0xff]  }
 0x1af   : > { %2034 = vmatprep.subr.bf16.mxu0 %v3926_v14  ;;  %v4013_v14 = vld [vmem:[%s4470_s28 + $0x744] ss:$8 sps:$4 sm:$0xff]  }
 0x1b0   : > { %2234 = vmatpush1.bf16.msra.mxu1 %v3921_v15  ;;  %v4008_v15 = vld [vmem:[%s4470_s28 + $0x640] ss:$8 sps:$4 sm:$0xff]  }
 0x1b1   : > { %2235 = vmatprep.subr.bf16.mxu1 %v3929_v16  ;;  %v4016_v16 = vld [vmem:[%s4470_s28 + $0x654] ss:$8 sps:$4 sm:$0xff]  }
 0x1b2   : > { %2035 = vmatpush1.bf16.msra.mxu0 %v3924_v17  ;;  %v4011_v17 = vld [vmem:[%s4470_s28 + $0x740] ss:$8 sps:$4 sm:$0xff]  }
 0x1b3   : > { %2036 = vmatprep.subr.bf16.mxu0 %v3932_v18  ;;  %v4019_v18 = vld [vmem:[%s4470_s28 + $0x754] ss:$8 sps:$4 sm:$0xff]  }
 0x1b4   : > { %2236 = vmatpush1.bf16.msra.mxu1 %v3927_v19  ;;  %v4014_v19 = vld [vmem:[%s4470_s28 + $0x650] ss:$8 sps:$4 sm:$0xff]  }
 0x1b5   : > { %2237 = vmatprep.subr.bf16.mxu1 %v3935_v20  ;;  %v4022_v20 = vld [vmem:[%s4470_s28 + $0x664] ss:$8 sps:$4 sm:$0xff]  }
 0x1b6   : > { %2037 = vmatpush1.bf16.msra.mxu0 %v3930_v21  ;;  %v4017_v21 = vld [vmem:[%s4470_s28 + $0x750] ss:$8 sps:$4 sm:$0xff]  }
 0x1b7   : > { %2038 = vmatprep.subr.bf16.mxu0 %v3938_v22  ;;  %v4025_v22 = vld [vmem:[%s4470_s28 + $0x764] ss:$8 sps:$4 sm:$0xff]  }
 0x1b8   : > { %2238 = vmatpush1.bf16.msra.mxu1 %v3933_v23  ;;  %v4020_v23 = vld [vmem:[%s4470_s28 + $0x660] ss:$8 sps:$4 sm:$0xff]  }
 0x1b9   : > { %2239 = vmatprep.subr.bf16.mxu1 %v3941_v24  ;;  %v4028_v24 = vld [vmem:[%s4470_s28 + $0x674] ss:$8 sps:$4 sm:$0xff]  }
 0x1ba   : > { %2039 = vmatpush1.bf16.msra.mxu0 %v3936_v26  ;;  %v4023_v26 = vld [vmem:[%s4470_s28 + $0x760] ss:$8 sps:$4 sm:$0xff]  }
 0x1bb   : > { %2040 = vmatprep.subr.bf16.mxu0 %v3944_v27  ;;  %v4031_v27 = vld [vmem:[%s4470_s28 + $0x774] ss:$8 sps:$4 sm:$0xff]  }
 0x1bc   : > { %2240 = vmatpush1.bf16.msra.mxu1 %v3939_v28  ;;  %v4026_v28 = vld [vmem:[%s4470_s28 + $0x670] ss:$8 sps:$4 sm:$0xff]  }
 0x1bd   : > { %2241 = vmatprep.subr.bf16.mxu1 %v3947_v29  ;;  %v4034_v29 = vld [vmem:[%s4470_s28 + $0x684] ss:$8 sps:$4 sm:$0xff]  }
 0x1be   : > { %2041 = vmatpush1.bf16.msra.mxu0 %v3942_v31  ;;  %v4029_v31 = vld [vmem:[%s4470_s28 + $0x770] ss:$8 sps:$4 sm:$0xff]  }
 0x1bf   : > { %2042 = vmatprep.subr.bf16.mxu0 %v3950_v32  ;;  %v4037_v32 = vld [vmem:[%s4470_s28 + $0x784] ss:$8 sps:$4 sm:$0xff]  }
 0x1c0   : > { %2242 = vmatpush1.bf16.msra.mxu1 %v3945_v36  ;;  %v4032_v36 = vld [vmem:[%s4470_s28 + $0x680] ss:$8 sps:$4 sm:$0xff]  }
 0x1c1   : > { %2243 = vmatprep.subr.bf16.mxu1 %v3953_v37  ;;  %v4040_v37 = vld [vmem:[%s4470_s28 + $0x694] ss:$8 sps:$4 sm:$0xff]  }
 0x1c2   : > { %2043 = vmatpush1.bf16.msra.mxu0 %v3948_v39  ;;  %v4035_v39 = vld [vmem:[%s4470_s28 + $0x780] ss:$8 sps:$4 sm:$0xff]  }
 0x1c3   : > { %2044 = vmatprep.subr.bf16.mxu0 %v3956_v40  ;;  %v4043_v40 = vld [vmem:[%s4470_s28 + $0x794] ss:$8 sps:$4 sm:$0xff]  }
 0x1c4   : > { %2244 = vmatpush1.bf16.msra.mxu1 %v3951_v41  ;;  %v4038_v41 = vld [vmem:[%s4470_s28 + $0x690] ss:$8 sps:$4 sm:$0xff]  }
 0x1c5   : > { %2245 = vmatprep.subr.bf16.mxu1 %v3959_v43  ;;  %v4046_v43 = vld [vmem:[%s4470_s28 + $0x6a4] ss:$8 sps:$4 sm:$0xff]  }
 0x1c6   : > { %2045 = vmatpush1.bf16.msra.mxu0 %v3954_v44  ;;  %v4041_v44 = vld [vmem:[%s4470_s28 + $0x790] ss:$8 sps:$4 sm:$0xff]  }
 0x1c7   : > { %2046 = vmatprep.subr.bf16.mxu0 %v3962_v47  ;;  %v4049_v47 = vld [vmem:[%s4470_s28 + $0x7a4] ss:$8 sps:$4 sm:$0xff]  }
 0x1c8   : > { %2246 = vmatpush1.bf16.msra.mxu1 %v3957_v49  ;;  %v4044_v49 = vld [vmem:[%s4470_s28 + $0x6a0] ss:$8 sps:$4 sm:$0xff]  }
 0x1c9   : > { %2247 = vmatprep.subr.bf16.mxu1 %v3965_v50  ;;  %v4052_v50 = vld [vmem:[%s4470_s28 + $0x6b4] ss:$8 sps:$4 sm:$0xff]  }
 0x1ca   : > { %2047 = vmatpush1.bf16.msra.mxu0 %v3960_v51  ;;  %v4047_v51 = vld [vmem:[%s4470_s28 + $0x7a0] ss:$8 sps:$4 sm:$0xff]  }
 0x1cb   : > { %2048 = vmatprep.subr.bf16.mxu0 %v3968_v53  ;;  %v4055_v53 = vld [vmem:[%s4470_s28 + $0x7b4] ss:$8 sps:$4 sm:$0xff]  }
 0x1cc   : > { %2248 = vmatpush1.bf16.msra.mxu1 %v3963_v55  ;;  %v4050_v55 = vld [vmem:[%s4470_s28 + $0x6b0] ss:$8 sps:$4 sm:$0xff]  }
 0x1cd   : > { %2249 = vmatprep.subr.bf16.mxu1 %v3971_v56  ;;  %v4058_v56 = vld [vmem:[%s4470_s28 + $0x6c4] ss:$8 sps:$4 sm:$0xff]  }
 0x1ce   : > { %2049 = vmatpush1.bf16.msra.mxu0 %v3966_v46  ;;  %v4053_v46 = vld [vmem:[%s4470_s28 + $0x7b0] ss:$8 sps:$4 sm:$0xff]  }
 0x1cf   : > { %2050 = vmatprep.subr.bf16.mxu0 %v3974_v58  ;;  %v4061_v58 = vld [vmem:[%s4470_s28 + $0x7c4] ss:$8 sps:$4 sm:$0xff]  }
 0x1d0   : > { %2250 = vmatpush1.bf16.msra.mxu1 %v3969_v52  ;;  %v4056_v52 = vld [vmem:[%s4470_s28 + $0x6c0] ss:$8 sps:$4 sm:$0xff]  }
 0x1d1   : > { %2251 = vmatprep.subr.bf16.mxu1 %v3977_v59  ;;  %v4064_v59 = vld [vmem:[%s4470_s28 + $0x6d4] ss:$8 sps:$4 sm:$0xff]  }
 0x1d2   : > { %2051 = vmatpush1.bf16.msra.mxu0 %v3972_v54  ;;  %v4059_v54 = vld [vmem:[%s4470_s28 + $0x7c0] ss:$8 sps:$4 sm:$0xff]  }
 0x1d3   : > { %2052 = vmatprep.subr.bf16.mxu0 %v3980_v60  ;;  %v4067_v60 = vld [vmem:[%s4470_s28 + $0x7d4] ss:$8 sps:$4 sm:$0xff]  }
 0x1d4   : > { %2252 = vmatpush1.bf16.msra.mxu1 %v3975_v61  ;;  %v4062_v61 = vld [vmem:[%s4470_s28 + $0x6d0] ss:$8 sps:$4 sm:$0xff]  }
 0x1d5   : > { %2253 = vmatprep.subr.bf16.mxu1 %v3983_v34  ;;  %v4070_v34 = vld [vmem:[%s4470_s28 + $0x6e4] ss:$8 sps:$4 sm:$0xff]  }
 0x1d6   : > { %2053 = vmatpush1.bf16.msra.mxu0 %v3978_v0  ;;  %v4065_v0 = vld [vmem:[%s4470_s28 + $0x7d0] ss:$8 sps:$4 sm:$0xff]  }
 0x1d7   : > { %2424 = vmatprep.subr.bf16.mxu0 %v3986_v25  ;;  %v4073_v25 = vld [vmem:[%s4470_s28 + $0x7e4] ss:$8 sps:$4 sm:$0xff]  }
 0x1d8   : > { %2254 = vmatpush1.bf16.msra.mxu1 %v3981_v33  ;;  %v4068_v33 = vld [vmem:[%s4470_s28 + $0x6e0] ss:$8 sps:$4 sm:$0xff]  }
 0x1d9   : > { %2055 = vmatmul.mubr.bf16.vlgmr.msra.gmra.mrb[12].mxu0 %v794_v1  ;;  %2625 = vmatprep.subr.bf16.mxu1 %v3989_v30  ;;  %v4076_v30 = vld [vmem:[%s4470_s28 + $0x6f4] ss:$8 sps:$4 sm:$0xff]  }
 0x1da   : > { %2425 = vmatpush1.bf16.msra.mxu0 %v3984_v35  ;;  %2456 = vmatprep.mubr.bf16.mxu0 %v799_v3  ;;  %v4071_v35 = vld [vmem:[%s4470_s28 + $0x7e0] ss:$8 sps:$4 sm:$0xff]   ;;  %v4079_v1 = vld [vmem:[%s4470_s28 + $0x7f4] ss:$8 sps:$4 sm:$0xff]   ;;  %v4077_v3 = vld [vmem:[%s4470_s28 + $0x7f0] ss:$8 sps:$4 sm:$0xff]  }
 0x1db   : > { %2256 = vmatmul.mubr.bf16.vlgmr.msra.gmra.mrb[12].mxu1 %v796_v4  ;;  %2426 = vmatprep.subr.bf16.mxu0 %v3992_v2  ;;  %v4074_v2 = vld [vmem:[%s4470_s28 + $0x6f0] ss:$8 sps:$4 sm:$0xff]   ;;  %v800_v4 = vpack.c.bf16 %v4698_v63, %v4698_v63  ;;  %s4976_s28 = scalar_lea.hbm %s5051_s4, %s3491_s21 }
 0x1dc   : > { %2626 = vmatpush1.bf16.msra.mxu1 %v3987_v42  ;;  %2657 = vmatprep.mubr.bf16.mxu1 %v801_v38  ;;  %v798_v42 = vpack.c.bf16 %v4689_v48, %v4689_v48 }
 0x1dd   : > { %2627 = vmatprep.subr.bf16.mxu1 %v3995_v5 }
 0x1de   : > { %2427 = vmatpush1.bf16.msra.mxu0 %v3990_v6 }
 0x1df   : > { %2428 = vmatprep.subr.bf16.mxu0 %v3998_v45 }
 0x1e0   : > { %2628 = vmatpush1.bf16.msra.mxu1 %v3993_v57 }
 0x1e1   : > { %2629 = vmatprep.subr.bf16.mxu1 %v4001_v7 }
 0x1e2   : > { %2429 = vmatpush1.bf16.msra.mxu0 %v3996_v8 }
 0x1e3   : > { %2430 = vmatprep.subr.bf16.mxu0 %v4004_v9 }
 0x1e4   : > { %2630 = vmatpush1.bf16.msra.mxu1 %v3999_v62 }
 0x1e5   : > { %2631 = vmatprep.subr.bf16.mxu1 %v4007_v10 }
 0x1e6   : > { %2431 = vmatpush1.bf16.msra.mxu0 %v4002_v11 }
 0x1e7   : > { %2432 = vmatprep.subr.bf16.mxu0 %v4010_v12 }
 0x1e8   : > { %2632 = vmatpush1.bf16.msra.mxu1 %v4005_v13 }
 0x1e9   : > { %2633 = vmatprep.subr.bf16.mxu1 %v4013_v14 }
 0x1ea   : > { %2433 = vmatpush1.bf16.msra.mxu0 %v4008_v15 }
 0x1eb   : > { %2434 = vmatprep.subr.bf16.mxu0 %v4016_v16 }
 0x1ec   : > { %2634 = vmatpush1.bf16.msra.mxu1 %v4011_v17 }
 0x1ed   : > { %2635 = vmatprep.subr.bf16.mxu1 %v4019_v18 }
 0x1ee   : > { %2435 = vmatpush1.bf16.msra.mxu0 %v4014_v19 }
 0x1ef   : > { %2436 = vmatprep.subr.bf16.mxu0 %v4022_v20 }
 0x1f0   : > { %2636 = vmatpush1.bf16.msra.mxu1 %v4017_v21 }
 0x1f1   : > { %2637 = vmatprep.subr.bf16.mxu1 %v4025_v22 }
 0x1f2   : > { %2437 = vmatpush1.bf16.msra.mxu0 %v4020_v23 }
 0x1f3   : > { %2438 = vmatprep.subr.bf16.mxu0 %v4028_v24 }
 0x1f4   : > { %2638 = vmatpush1.bf16.msra.mxu1 %v4023_v26 }
 0x1f5   : > { %2639 = vmatprep.subr.bf16.mxu1 %v4031_v27 }
 0x1f6   : > { %2439 = vmatpush1.bf16.msra.mxu0 %v4026_v28 }
 0x1f7   : > { %2440 = vmatprep.subr.bf16.mxu0 %v4034_v29 }
 0x1f8   : > { %2640 = vmatpush1.bf16.msra.mxu1 %v4029_v31 }
 0x1f9   : > { %2641 = vmatprep.subr.bf16.mxu1 %v4037_v32 }
 0x1fa   : > { %2441 = vmatpush1.bf16.msra.mxu0 %v4032_v36 }
 0x1fb   : > { %2442 = vmatprep.subr.bf16.mxu0 %v4040_v37 }
 0x1fc   : > { %2642 = vmatpush1.bf16.msra.mxu1 %v4035_v39 }
 0x1fd   : > { %2643 = vmatprep.subr.bf16.mxu1 %v4043_v40 }
 0x1fe   : > { %2443 = vmatpush1.bf16.msra.mxu0 %v4038_v41 }
 0x1ff   : > { %2444 = vmatprep.subr.bf16.mxu0 %v4046_v43 }
 0x200   : > { %2644 = vmatpush1.bf16.msra.mxu1 %v4041_v44 }
 0x201   : > { %2645 = vmatprep.subr.bf16.mxu1 %v4049_v47 }
 0x202   : > { %2445 = vmatpush1.bf16.msra.mxu0 %v4044_v49  ;;  %v2666_v49 = vld [vmem:[%s4491_s6] sm:$0xff] }
 0x203   : > { %2446 = vmatprep.subr.bf16.mxu0 %v4052_v50 }
 0x204   : > { %2646 = vmatpush1.bf16.msra.mxu1 %v4047_v51 }
 0x205   : > { %2647 = vmatprep.subr.bf16.mxu1 %v4055_v53 }
 0x206   : > { %2447 = vmatpush1.bf16.msra.mxu0 %v4050_v55 }
 0x207   : > { %2448 = vmatprep.subr.bf16.mxu0 %v4058_v56 }
 0x208   : > { %2648 = vmatpush1.bf16.msra.mxu1 %v4053_v46 }
 0x209   : > { %2649 = vmatprep.subr.bf16.mxu1 %v4061_v58 }
 0x20a   : > { %2449 = vmatpush1.bf16.msra.mxu0 %v4056_v52 }
 0x20b   : > { %2450 = vmatprep.subr.bf16.mxu0 %v4064_v59 }
 0x20c   : > { %2650 = vmatpush1.bf16.msra.mxu1 %v4059_v54 }
 0x20d   : > { %2651 = vmatprep.subr.bf16.mxu1 %v4067_v60 }
 0x20e   : > { %2451 = vmatpush1.bf16.msra.mxu0 %v4062_v61 }
 0x20f   : > { %2452 = vmatprep.subr.bf16.mxu0 %v4070_v34 }
 0x210   : > { %2652 = vmatpush1.bf16.msra.mxu1 %v4065_v0 }
 0x211   : > { %2653 = vmatprep.subr.bf16.mxu1 %v4073_v25 }
 0x212   : > { %2453 = vmatpush1.bf16.msra.mxu0 %v4068_v33 }
 0x213   : > { %2454 = vmatprep.subr.bf16.mxu0 %v4076_v30 }
 0x214   : > { %2654 = vmatpush1.bf16.msra.mxu1 %v4071_v35 }
 0x215   : > { %2655 = vmatprep.subr.bf16.mxu1 %v4079_v1 }
 0x216   : > { %2455 = vmatpush1.bf16.msra.mxu0 %v4074_v2 }
 0x218   : > { %2656 = vmatpush1.bf16.msra.mxu1 %v4077_v3 }
 0x219   : > { %2457 = vmatmul.mubr.bf16.vlgmr.msra.gmra.mrb[16].mxu0 %v798_v42 }
 0x21a   : > { %3521 = vmatprep.mubr.msk.f32.mxu0 %vm354_vm0, %v2666_v49 }
 0x21b   : > { %2658 = vmatmul.mubr.bf16.vlgmr.msra.gmra.mrb[16].mxu1 %v800_v4 }
 0x21c   : > { %3537 = vmatprep.mubr.msk.f32.mxu1 %vm354_vm0, %v2666_v49 }
 0x22c   : > { %v1252_v5 = vpop.f32.mrb[4].mxu0 }
 0x22d   : > { %v2880_v38 = vrot.slane %v1252_v5, 1  ;;  %v1254_v6 = vpop.f32.mrb[5].mxu0 }
 0x22e   : > { %v2895_v45 = vrot.slane %v1254_v6, 1  ;;  %v1256_v57 = vpop.f32.mrb[6].mxu0  ;;  %v1453_v7 = vpop.f32.mrb[4].mxu1 }
 0x22f   : > { %v2682_v8 = vrot.slane %v1453_v7, 7  ;;  %v2881_v9 = vsel %vm2683_vm2, %v1453_v7, %v2880_v38  ;;  %v1257_v62 = vpop.f32.mrb[7].mxu0  ;;  %v1455_v10 = vpop.f32.mrb[5].mxu1 }
 0x230   : > { %v2712_v11 = vrot.slane %v1455_v10, 7  ;;  %v2896_v12 = vsel %vm2683_vm2, %v1455_v10, %v2895_v45  ;;  %v1457_v48 = vpop.f32.mrb[6].mxu1 }
 0x231   : > { %v2684_v13 = vsel %vm2683_vm2, %v2682_v8, %v1252_v5  ;;  %v1458_v14 = vpop.f32.mrb[7].mxu1 }
 0x232   : > { %v2713_v15 = vsel %vm2683_vm2, %v2712_v11, %v1254_v6 }
 0x26c   : > { %v1654_v16 = vpop.f32.mrb[8].mxu0 }
 0x26d   : > { %v2685_v63 = vrot.slane %v1654_v16, 6  ;;  %v2882_v17 = vrot.slane %v1654_v16, 7  ;;  %v1656_v18 = vpop.f32.mrb[9].mxu0 }
 0x26e   : > { %v2714_v19 = vrot.slane %v1656_v18, 6  ;;  %v2897_v20 = vrot.slane %v1656_v18, 7  ;;  %v1658_v21 = vpop.f32.mrb[10].mxu0  ;;  %v1855_v22 = vpop.f32.mrb[8].mxu1 }
 0x26f   : > { %v2687_v23 = vsel %vm2686_vm3, %v2685_v63, %v2684_v13  ;;  %v2883_v24 = vsel %vm2686_vm3, %v2882_v17, %v2881_v9  ;;  %v2688_v26 = vrot.slane %v1855_v22, 5  ;;  %v2884_v27 = vrot.slane %v1855_v22, 6  ;;  %v1659_v28 = vpop.f32.mrb[11].mxu0  ;;  %v1857_v29 = vpop.f32.mrb[9].mxu1 }
 0x270   : > { %v2715_v31 = vsel %vm2686_vm3, %v2714_v19, %v2713_v15  ;;  %v2898_v32 = vsel %vm2686_vm3, %v2897_v20, %v2896_v12  ;;  %v2716_v36 = vrot.slane %v1857_v29, 5  ;;  %v2899_v37 = vrot.slane %v1857_v29, 6  ;;  %v1859_v39 = vpop.f32.mrb[10].mxu1  ;;  %v2668_v28 = vld [vmem:[%s4491_s6 + $0x10] sm:$0xff]  ;;  %v2669_v29 = vld [vmem:[%s4491_s6 + $0x18] sm:$0xff] }
 0x271   : > { %v2690_v40 = vsel %vm2689_vm4, %v2688_v26, %v2687_v23  ;;  %v2885_v41 = vsel %vm2689_vm4, %v2884_v27, %v2883_v24  ;;  %v1860_v43 = vpop.f32.mrb[11].mxu1  ;;  %v2667_v27 = vld [vmem:[%s4491_s6 + $0x8] sm:$0xff] }
 0x272   : > { %v2717_v44 = vsel %vm2689_vm4, %v2716_v36, %v2715_v31  ;;  %v2900_v47 = vsel %vm2689_vm4, %v2899_v37, %v2898_v32  ;;  %v2670_v31 = vld [vmem:[%s4491_s6 + $0x20] sm:$0xff]  ;;  %v2671_v32 = vld [vmem:[%s4491_s6 + $0x28] sm:$0xff]  ;;  %v2672_v36 = vld [vmem:[%s4491_s6 + $0x30] sm:$0xff] }
 0x273   : > { %v2673_v37 = vld [vmem:[%s4491_s6 + $0x38] sm:$0xff]  ;;  %v2728_v39 = vld [vmem:[%s4493_s7 + $0x8] sm:$0xff]  ;;  %v3466_v43 = vld [vmem:[%s4493_s7 + $0x40] sm:$0xff] }
 0x2ac   : > { %v2056_v50 = vpop.f32.mrb[12].mxu0 }
 0x2ad   : > { %v2691_v51 = vrot.slane %v2056_v50, 4  ;;  %v2886_v53 = vrot.slane %v2056_v50, 5  ;;  %v2058_v55 = vpop.f32.mrb[13].mxu0 }
 0x2ae   : > { %v2718_v56 = vrot.slane %v2058_v55, 4  ;;  %v2901_v46 = vrot.slane %v2058_v55, 5  ;;  %v2060_v58 = vpop.f32.mrb[14].mxu0  ;;  %v2257_v52 = vpop.f32.mrb[12].mxu1 }
 0x2af   : > { %v2693_v59 = vsel %vm2692_vm5, %v2691_v51, %v2690_v40  ;;  %v2887_v54 = vsel %vm2692_vm5, %v2886_v53, %v2885_v41  ;;  %v2694_v60 = vrot.slane %v2257_v52, 3  ;;  %v2888_v61 = vrot.slane %v2257_v52, 4  ;;  %v2061_v34 = vpop.f32.mrb[15].mxu0  ;;  %v2259_v0 = vpop.f32.mrb[13].mxu1  ;;  %v3467_v40 = vld [vmem:[%s4493_s7 + $0x48] sm:$0xff]  ;;  %v2727_v41 = vld [vmem:[%s4493_s7] sm:$0xff] }
 0x2b0   : > { %v2719_v25 = vsel %vm2692_vm5, %v2718_v56, %v2717_v44  ;;  %v2902_v33 = vsel %vm2692_vm5, %v2901_v46, %v2900_v47  ;;  %v2720_v30 = vrot.slane %v2259_v0, 3  ;;  %v2903_v35 = vrot.slane %v2259_v0, 4  ;;  %v2261_v1 = vpop.f32.mrb[14].mxu1  ;;  %v2730_v46 = vld [vmem:[%s4493_s7 + $0x18] sm:$0xff]  ;;  %v2729_v52 = vld [vmem:[%s4493_s7 + $0x10] sm:$0xff] }
 0x2b1   : > { %v2696_v2 = vsel %vm2695_vm6, %v2694_v60, %v2693_v59  ;;  %v2889_v3 = vsel %vm2695_vm6, %v2888_v61, %v2887_v54  ;;  %v2262_v42 = vpop.f32.mrb[15].mxu1  ;;  %v3469_v58 = vld [vmem:[%s4493_s7 + $0x58] sm:$0xff]  ;;  %v3468_v59 = vld [vmem:[%s4493_s7 + $0x50] sm:$0xff]  ;;  %v3471_v1 = vld [vmem:[%s4493_s7 + $0x68] sm:$0xff] }
 0x2b2   : > { %v2721_v4 = vsel %vm2695_vm6, %v2720_v30, %v2719_v25  ;;  %v2904_v5 = vsel %vm2695_vm6, %v2903_v35, %v2902_v33  ;;  %v2732_v35 = vld [vmem:[%s4493_s7 + $0x28] sm:$0xff] }
 0x2ec   : > { %v2458_v38 = vpop.f32.mrb[16].mxu0 }
 0x2ed   : > { %v2697_v6 = vrot.slane %v2458_v38, 2  ;;  %v2890_v45 = vrot.slane %v2458_v38, 3  ;;  %v2460_v57 = vpop.f32.mrb[17].mxu0 }
 0x2ee   : > { %v2722_v7 = vrot.slane %v2460_v57, 2  ;;  %v2905_v8 = vrot.slane %v2460_v57, 3  ;;  %v2462_v9 = vpop.f32.mrb[18].mxu0  ;;  %v2659_v62 = vpop.f32.mrb[16].mxu1 }
 0x2ef   : > { %v2699_v10 = vsel %vm2698_vm7, %v2697_v6, %v2696_v2  ;;  %v2891_v11 = vsel %vm2698_vm7, %v2890_v45, %v2889_v3  ;;  %v2700_v12 = vrot.slane %v2659_v62, 1  ;;  %v2892_v48 = vrot.slane %v2659_v62, 2  ;;  %v2463_v13 = vpop.f32.mrb[19].mxu0  ;;  %v2661_v14 = vpop.f32.mrb[17].mxu1  ;;  %v2731_v2 = vld [vmem:[%s4493_s7 + $0x20] sm:$0xff]  ;;  %v3473_v9 = vld [vmem:[%s4493_s7 + $0x78] sm:$0xff] }
 0x2f0   : > { %v2723_v15 = vsel %vm2698_vm7, %v2722_v7, %v2721_v4  ;;  %v2906_v16 = vsel %vm2698_vm7, %v2905_v8, %v2904_v5  ;;  %v2724_v63 = vrot.slane %v2661_v14, 1  ;;  %v2907_v17 = vrot.slane %v2661_v14, 2  ;;  %v2663_v18 = vpop.f32.mrb[18].mxu1  ;;  %v3470_v3 = vld [vmem:[%s4493_s7 + $0x60] sm:$0xff]  ;;  %v2734_v8 = vld [vmem:[%s4493_s7 + $0x38] sm:$0xff]  ;;  %v2733_v62 = vld [vmem:[%s4493_s7 + $0x30] sm:$0xff] }
 0x2f1   : > { %v2664_v19 = vpop.f32.mrb[19].mxu1  ;;  %v2702_v20 = vsel %vm2701_vm8, %v2700_v12, %v2699_v10  ;;  %v2893_v21 = vsel %vm2701_vm8, %v2892_v48, %v2891_v11  ;;  %v3472_v10 = vld [vmem:[%s4493_s7 + $0x70] sm:$0xff] }
 0x2f2   : > { %v2725_v22 = vsel %vm2701_vm8, %v2724_v63, %v2723_v15  ;;  %v2908_v23 = vsel %vm2701_vm8, %v2907_v17, %v2906_v16 }
 0x2f3   : > { %v3557_v24 = vpack.c.bf16 %v2725_v22, %v2702_v20  ;;  %v3561_v26 = vpack.c.bf16 %v2908_v23, %v2893_v21 }
 0x2f5   : > { %3558 = vmatprep.subr.bf16.mxu0 %v3557_v24  ;;  %3562 = vmatprep.subr.bf16.mxu1 %v3561_v26 }
 0x2f6   : > { %3560 = vmatpush3.bf16.msra.mxu0 %v3557_v24  ;;  %3564 = vmatpush3.bf16.msra.mxu1 %v3561_v26 }
 0x2f9   : > { %3522 = vmatmul.mubr.msk.f32.vlgmr.msra.gmra.mrb[2].mxu0 %vm354_vm0, %v2667_v27  ;;  %3538 = vmatmul.mubr.msk.f32.vlgmr.msra.gmra.mrb[2].mxu1 %vm354_vm0, %v2667_v27 }
 0x2fa   : > { %3524 = vmatprep.mubr.msk.f32.mxu0 %vm354_vm0, %v2668_v28  ;;  %3540 = vmatprep.mubr.msk.f32.mxu1 %vm354_vm0, %v2668_v28 }
 0x2fd   : > { %3525 = vmatmul.mubr.msk.f32.gmra.mrb[20].mxu0 %vm354_vm0, %v2669_v29  ;;  %3541 = vmatmul.mubr.msk.f32.gmra.mrb[20].mxu1 %vm354_vm0, %v2669_v29 }
 0x2fe   : > { %3527 = vmatprep.mubr.msk.f32.mxu0 %vm354_vm0, %v2670_v31  ;;  %3543 = vmatprep.mubr.msk.f32.mxu1 %vm354_vm0, %v2670_v31 }
 0x301   : > { %3528 = vmatmul.mubr.msk.f32.gmra.mrb[22].mxu0 %vm354_vm0, %v2671_v32  ;;  %3544 = vmatmul.mubr.msk.f32.gmra.mrb[22].mxu1 %vm354_vm0, %v2671_v32 }
 0x302   : > { %3530 = vmatprep.mubr.msk.f32.mxu0 %vm354_vm0, %v2672_v36  ;;  %3546 = vmatprep.mubr.msk.f32.mxu1 %vm354_vm0, %v2672_v36 }
 0x305   : > { %3531 = vmatmul.mubr.msk.f32.gmra.mrb[24].mxu0 %vm354_vm0, %v2673_v37  ;;  %3547 = vmatmul.mubr.msk.f32.gmra.mrb[24].mxu1 %vm354_vm0, %v2673_v37 }
 0x3cc   : > { %v3523_v44 = vpop.f32.mrb[2].mxu0  ;;  %v3539_v47 = vpop.f32.mrb[2].mxu1 }
 0x3cd   : > { %v2865_v49 = vadd.f32 %v3523_v44, %v2728_v39  ;;  %v3025_v50 = vadd.f32 %v3539_v47, %v3467_v40  ;;  %v2825_v51 = vpop.f32.mrb[3].mxu0  ;;  %v2985_v53 = vpop.f32.mrb[3].mxu1 }
 0x3ce   : > { %v2864_v55 = vadd.f32 %v2825_v51, %v2727_v41  ;;  %v3024_v56 = vadd.f32 %v3466_v43, %v2985_v53 }
 0x3cf   : > { %2873 = vst [vmem:[%s4493_s7 + $0x8] sm:$0xff] %v2865_v49  ;;  %3483 = vst [vmem:[%s4493_s7 + $0x48] sm:$0xff] %v3025_v50 }
 0x3d0   : > { %2872 = vst [vmem:[%s4493_s7] sm:$0xff] %v2864_v55  ;;  %3482 = vst [vmem:[%s4493_s7 + $0x40] sm:$0xff] %v3024_v56  ;;  %v3526_v54 = vpop.f32.mrb[20].mxu0  ;;  %v3542_v60 = vpop.f32.mrb[20].mxu1 }
 0x3d1   : > { %v2867_v61 = vadd.f32 %v3526_v54, %v2730_v46  ;;  %v3027_v34 = vadd.f32 %v3542_v60, %v3469_v58  ;;  %v2835_v0 = vpop.f32.mrb[21].mxu0  ;;  %v2995_v25 = vpop.f32.mrb[21].mxu1 }
 0x3d2   : > { %v2866_v33 = vadd.f32 %v2835_v0, %v2729_v52  ;;  %v3026_v30 = vadd.f32 %v3468_v59, %v2995_v25 }
 0x3d3   : > { %2875 = vst [vmem:[%s4493_s7 + $0x18] sm:$0xff] %v2867_v61  ;;  %3485 = vst [vmem:[%s4493_s7 + $0x58] sm:$0xff] %v3027_v34 }
 0x3d4   : > { %2874 = vst [vmem:[%s4493_s7 + $0x10] sm:$0xff] %v2866_v33  ;;  %3484 = vst [vmem:[%s4493_s7 + $0x50] sm:$0xff] %v3026_v30  ;;  %v3529_v42 = vpop.f32.mrb[22].mxu0  ;;  %v3545_v4 = vpop.f32.mrb[22].mxu1 }
 0x3d5   : > { %v2869_v5 = vadd.f32 %v3529_v42, %v2732_v35  ;;  %v3029_v38 = vadd.f32 %v3545_v4, %v3471_v1  ;;  %v2845_v6 = vpop.f32.mrb[23].mxu0  ;;  %v3005_v45 = vpop.f32.mrb[23].mxu1 }
 0x3d6   : > { %v2868_v57 = vadd.f32 %v2845_v6, %v2731_v2  ;;  %v3028_v7 = vadd.f32 %v3470_v3, %v3005_v45 }
 0x3d7   : > { %2877 = vst [vmem:[%s4493_s7 + $0x28] sm:$0xff] %v2869_v5  ;;  %3487 = vst [vmem:[%s4493_s7 + $0x68] sm:$0xff] %v3029_v38 }
 0x3d8   : > { %2876 = vst [vmem:[%s4493_s7 + $0x20] sm:$0xff] %v2868_v57  ;;  %3486 = vst [vmem:[%s4493_s7 + $0x60] sm:$0xff] %v3028_v7  ;;  %v3532_v11 = vpop.f32.mrb[24].mxu0  ;;  %v3548_v12 = vpop.f32.mrb[24].mxu1 }
 0x3d9   : > { %v2871_v48 = vadd.f32 %v3532_v11, %v2734_v8  ;;  %v3031_v13 = vadd.f32 %v3548_v12, %v3473_v9  ;;  %v2855_v14 = vpop.f32.mrb[25].mxu0  ;;  %v3015_v15 = vpop.f32.mrb[25].mxu1 }
 0x3da   : > { %v2870_v16 = vadd.f32 %v2855_v14, %v2733_v62  ;;  %v3030_v63 = vadd.f32 %v3472_v10, %v3015_v15 }
 0x3db   : > { %2879 = vst [vmem:[%s4493_s7 + $0x38] sm:$0xff] %v2871_v48  ;;  %3489 = vst [vmem:[%s4493_s7 + $0x78] sm:$0xff] %v3031_v13 }
 0x3dc   : > { %2878 = vst [vmem:[%s4493_s7 + $0x30] sm:$0xff] %v2870_v16  ;;  %3488 = vst [vmem:[%s4493_s7 + $0x70] sm:$0xff] %v3030_v63 }
 0x3dd   : > { %4123 = shalt.err (!%p4120_p1)
}
 0x3de   : > { %s4124_s8 = scalar_lea.hbm %s4976_s28, 2048  ;;  %s4128_s9 = scalar_lea.hbm %s5051_s4, 4096 }
 0x3df   : > { %p4125_p2 = scmp.ne.s32.totalorder %s4976_s28, %s4124_s8  ;;  %p4129_p7 = scmp.lt.u32.totalorder %s4976_s28, %s5051_s4 }
 0x3e0   : > { %p4130_p3 = scmp.lt.u32.totalorder %s4128_s9, %s4124_s8  ;;  %p4132_p9 = scmp.lt.u32.totalorder %s4124_s8, %s4976_s28 }
 0x3e1   : > { %p4126_p12 = pnand %p4125_p2, %p5078_p11 }
 0x3e2   : > { %p4131_p4 = por %p4130_p3, %p4129_p7 }
 0x3e3   : > { %p4127_p6 = pneg %p4126_p12 }
 0x3e4   : > { %p4133_p0 = por %p4132_p9, %p4131_p4 }
 0x3e6   : > { %p4134_p8 = pnand %p4133_p0, %p4127_p6 }
 0x3e8   : > { %4137 = shalt.err (!%p4134_p8)
}
 0x3e9   : > { %s4253_s23 = smov 128   ;;  %s4254_s6 = smov 256  }
 0x3ea   : > { %s4255_s7 = smov 8  }
 0x3eb   : > { %3578 = dma.vmem_to_hbm [thread:$0]  (%p5078_p11), %s4978_s13, 2048, %s4976_s28, %s4986_s12, %s4253_s23, %s4254_s6, %s4255_s7  }
 0x3ec PF: > { %p3591_p10 = scmp.ge.s32.totalorder %s4236_s25, 2  ;;  %s3068_s21 = sand.u32 1, %s4196_s15  }
 0x3ed   : > { %p5079_p13 = scmp.ne.s32.totalorder %s5073_s11, 0  ;;  %s3069_s26 = scalar_lea.sflag [#allocation4], %s3068_s21 }
 0x3ef   : > { %p3585_p5 = pnand %p3591_p10, %p5079_p13 }
 0x3f1   : > { %4191 = dma.done.wait (!%p3585_p5), %s3069_s26, 2048  }
 0x3f2   : > { %4193 = vsyncadd (!%p3585_p5), %s3069_s26, 4294965248  ;;  %s21_s25 = sadd.s32 1, %s4236_s25   ;;  %s5080_s22 = sld [smem:[#allocation14_spill]] }
 0x3f3   : > { %p18_p1 = scmp.ge.s32.totalorder %s21_s25, 6   ;;  %s5081_s17 = sld [smem:[#allocation19_spill]] }
 0x3f4   : > { %s5082_s27 = sld [smem:[#allocation20_spill]]  ;;  %s5083_s21 = sld [smem:[#allocation15_spill]] }
 0x3f5   : > { %s5084_s13 = sld [smem:[#allocation16_spill]]  ;;  %s5085_s23 = sld [smem:[#allocation17_spill]] }
 0x3f6   : > { %s5086_s24 = sld [smem:[#allocation18_spill]]  ;;  %s5087_s15 = smov %s4200_s16 }
 0x3f7   : > { %s5089_s18 = smov %s4212_s19  ;;  %s5090_s19 = smov %s4216_s20 }
 0x3f8   : > { %s5088_s16 = smov %s5080_s22  ;;  %20 = sbr.rel (!%p18_p1) target bundleno = 10 (0xa), region = 103 }
 0x3fa   : > { %s5091_s20 = smov %s5082_s27 }
 0x3fb   : > { %s5092_s22 = smov %s5084_s13 }
 0x3ff   :  { %3074 = vsyncpa [#allocation3], 1 }
 0x400   :  { %3076 = vsyncpa [#allocation3 + $0x1], 1 }
 0x401   :  { %3077 = vsyncpa [#allocation6], 1 }
 0x402   :  { %3079 = vsyncpa [#allocation6 + $0x1], 1 }
 0x403   :  { %3080 = vsyncpa [#allocation4], 1 }
 0x404   :  { %3082 = vsyncpa [#allocation4 + $0x1], 1 }

</bundles_post_ra>
